<compile_context>
chip_gen: v7x
topology: tpu7x:2x2x1
jax: 0.10.0
libtpu: 0.0.40
codegen_flags: <defaults>
</compile_context>

<pallas_src>
import functools

import jax
import jax.numpy as jnp
from jax.experimental import pallas as pl
from jax.experimental.pallas import tpu as pltpu


def _round_up(x, m):
    return (x + m - 1) // m * m


# ---------------------------------------------------------------------------
# Pallas kernels
# ---------------------------------------------------------------------------
def _matmul_bias_act_kernel(x_ref, w_ref, b_ref, o_ref, *, activation):
    acc = jnp.dot(x_ref[...], w_ref[...], preferred_element_type=jnp.float32)
    acc = acc + b_ref[...]                       # (1, Np) broadcasts over rows
    if activation == "relu":
        acc = jnp.maximum(acc, 0.0)
    elif activation == "tanh":
        acc = jnp.tanh(acc)
    o_ref[...] = acc.astype(o_ref.dtype)


def matmul_bias_act(x, w, b, activation="none"):
    """act((M,K) @ (K,N) + b). bf16 operands / f32 accumulate, lane-dense N."""
    M, K = x.shape
    K2, N = w.shape
    assert K == K2
    Kp = _round_up(K, 8)           # MXU-feed friendly sublane count
    Np = _round_up(N, 128)         # lane-dense (unmasked) stores
    if Kp != K:
        x = jnp.pad(x, ((0, 0), (0, Kp - K)))
        w = jnp.pad(w, ((0, Kp - K), (0, 0)))
    if Np != N:
        w = jnp.pad(w, ((0, 0), (0, Np - N)))
        b = jnp.pad(b, (0, Np - N))
    xb = x.astype(jnp.bfloat16)                  # halve HBM/VMEM bytes, MXU rate
    wb = w.astype(jnp.bfloat16)
    b2 = b.reshape(1, Np).astype(jnp.float32)    # epilogue stays f32

    bm = 256 if (M > 256 and M % 256 == 0) else M
    kernel = functools.partial(_matmul_bias_act_kernel, activation=activation)
    out = pl.pallas_call(
        kernel,
        grid=(M // bm,),
        in_specs=[
            pl.BlockSpec((bm, Kp), lambda i: (i, 0)),
            pl.BlockSpec((Kp, Np), lambda i: (0, 0)),
            pl.BlockSpec((1, Np), lambda i: (0, 0)),
        ],
        out_specs=pl.BlockSpec((bm, Np), lambda i: (i, 0)),
        out_shape=jax.ShapeDtypeStruct((M, Np), jnp.float32),
        compiler_params=pltpu.CompilerParams(
            dimension_semantics=("parallel",),   # M tiles shard across TCs
            vmem_limit_bytes=32 * 1024 * 1024,
        ),
    )(xb, wb, b2)
    return out[:, :N] if Np != N else out


def _convt_up_tanh_kernel(p_ref, w_ref, b_ref, a_ref, o_ref):
    # ConvTranspose(32->3, stride 1, pad 1) + ReLU ...
    y = jnp.dot(p_ref[...], w_ref[...], preferred_element_type=jnp.float32)
    y = jnp.maximum(y + b_ref[...], 0.0)
    # ... then bilinear 2x upsample as one Kronecker interpolation matmul + Tanh.
    up = jnp.dot(a_ref[...], y.astype(jnp.bfloat16),
                 preferred_element_type=jnp.float32)
    o_ref[...] = jnp.tanh(up)


# ---------------------------------------------------------------------------
# Glue (NHWC throughout; all tensors are tiny and these ops fuse in XLA)
# ---------------------------------------------------------------------------
def _im2col(x, kh, kw, stride, pad):
    """x: (B, H, W, C) -> patches (B*Ho*Wo, kh*kw*C)."""
    B, H, W, C = x.shape
    xp = jnp.pad(x, ((0, 0), (pad, pad), (pad, pad), (0, 0)))
    Ho = (H + 2 * pad - kh) // stride + 1
    Wo = (W + 2 * pad - kw) // stride + 1
    cols = []
    for i in range(kh):
        for j in range(kw):
            cols.append(xp[:, i:i + (Ho - 1) * stride + 1:stride,
                              j:j + (Wo - 1) * stride + 1:stride, :])
    patches = jnp.concatenate(cols, axis=-1)          # (B, Ho, Wo, kh*kw*C)
    return patches.reshape(B * Ho * Wo, kh * kw * C), (B, Ho, Wo)


def conv2d_nhwc(x, weight, bias, stride, padding, activation):
    """weight: (C_out, C_in, KH, KW) as in PyTorch Conv2d."""
    C_out, C_in, KH, KW = weight.shape
    patches, (B, Ho, Wo) = _im2col(x, KH, KW, stride, padding)
    w2 = jnp.transpose(weight, (2, 3, 1, 0)).reshape(KH * KW * C_in, C_out)
    out = matmul_bias_act(patches, w2, bias, activation)
    return out.reshape(B, Ho, Wo, C_out)


def maxpool2x2_nhwc(x):
    # Plain XLA max of the 4 window taps; fuses into the next patch gather.
    a = x[:, 0::2, 0::2, :]
    b = x[:, 0::2, 1::2, :]
    c = x[:, 1::2, 0::2, :]
    d = x[:, 1::2, 1::2, :]
    return jnp.maximum(jnp.maximum(a, b), jnp.maximum(c, d))


def _ki(phase, d):
    """Kernel tap index for ConvTranspose2d(k=3, stride=2, pad=1) sub-pixel phase."""
    if phase == 0:
        return 1 if d == 0 else None
    return 2 if d == 0 else 0


def conv_transpose2d_s2_nhwc(x, weight, bias, activation):
    """ConvTranspose2d(C_in, C_out, 3, stride=2, padding=1, output_padding=1).

    Lowered to the 4 sub-pixel phases folded into a single matmul:
    patches (B*H*W, 4*C_in) @ W_comb (4*C_in, 4*C_out).  No dilation zeros.
    weight: (C_in, C_out, 3, 3) as in PyTorch.
    """
    C_in, C_out, KH, KW = weight.shape
    B, H, W, _ = x.shape
    xp = jnp.pad(x, ((0, 0), (0, 1), (0, 1), (0, 0)))           # zero pad bottom/right
    taps = [xp[:, dy:dy + H, dx:dx + W, :] for dy in (0, 1) for dx in (0, 1)]
    patches = jnp.concatenate(taps, axis=-1).reshape(B * H * W, 4 * C_in)

    w_rows = []
    for (dy, dx) in [(0, 0), (0, 1), (1, 0), (1, 1)]:           # tap blocks (rows)
        cols = []
        for (py, px) in [(0, 0), (0, 1), (1, 0), (1, 1)]:       # phase blocks (cols)
            a = _ki(py, dy)
            c = _ki(px, dx)
            if a is None or c is None:
                cols.append(jnp.zeros((C_in, C_out), weight.dtype))
            else:
                cols.append(weight[:, :, a, c])
            del a, c
        w_rows.append(jnp.concatenate(cols, axis=1))            # (C_in, 4*C_out)
    w_comb = jnp.concatenate(w_rows, axis=0)                    # (4*C_in, 4*C_out)
    b_comb = jnp.tile(bias, 4)                                  # (4*C_out,)

    out = matmul_bias_act(patches, w_comb, b_comb, activation)  # (B*H*W, 4*C_out)
    out = out.reshape(B, H, W, 2, 2, C_out)                     # (b, m, n, py, px, c)
    out = jnp.transpose(out, (0, 1, 3, 2, 4, 5)).reshape(B, 2 * H, 2 * W, C_out)
    return out


def _bilinear_matrix(H):
    """(2H, H) interpolation matrix matching PyTorch bilinear, align_corners=False."""
    out = 2 * H
    i = jnp.arange(out, dtype=jnp.float32)
    src = jnp.maximum((i + 0.5) / 2.0 - 0.5, 0.0)
    i0 = jnp.floor(src).astype(jnp.int32)
    frac = src - i0.astype(jnp.float32)
    i1 = jnp.minimum(i0 + 1, H - 1)
    A = jnp.zeros((out, H), jnp.float32)
    A = A.at[jnp.arange(out), i0].add(1.0 - frac)
    A = A.at[jnp.arange(out), i1].add(frac)
    return A


def convt3_upsample_tanh(x, weight, bias):
    """ConvTranspose2d(32,3,3,s=1,p=1)+ReLU, bilinear 2x, Tanh -- one Pallas kernel.

    x: (B, H, W, C_in) NHWC.  Returns (B, 2H, 2W, C_out) NHWC.
    """
    C_in, C_out, KH, KW = weight.shape
    B, H, W, _ = x.shape
    # stride-1 transposed conv == conv with the spatially flipped kernel, pad 1
    w_conv = jnp.transpose(weight[:, :, ::-1, ::-1], (1, 0, 2, 3))   # (C_out, C_in, 3, 3)
    w2 = jnp.transpose(w_conv, (2, 3, 1, 0)).reshape(KH * KW * C_in, C_out)
    patches, _ = _im2col(x, KH, KW, 1, 1)                            # (B*H*W, 9*C_in)

    Np = _round_up(C_out, 128)
    w2p = jnp.pad(w2, ((0, 0), (0, Np - C_out))).astype(jnp.bfloat16)
    b2p = jnp.pad(bias, (0, Np - C_out)).reshape(1, Np).astype(jnp.float32)

    # Block-diagonal (over batch) Kronecker bilinear-2x interpolation matrix.
    A = jnp.kron(_bilinear_matrix(H), _bilinear_matrix(W))           # (4HW, HW)
    A_bd = jnp.kron(jnp.eye(B, dtype=jnp.float32), A)                # (B*4HW, B*HW)

    M_in = B * H * W
    M_out = B * 4 * H * W
    K = KH * KW * C_in
    out = pl.pallas_call(
        _convt_up_tanh_kernel,
        grid=(1,),
        in_specs=[
            pl.BlockSpec((M_in, K), lambda i: (0, 0)),
            pl.BlockSpec((K, Np), lambda i: (0, 0)),
            pl.BlockSpec((1, Np), lambda i: (0, 0)),
            pl.BlockSpec((M_out, M_in), lambda i: (0, 0)),
        ],
        out_specs=pl.BlockSpec((M_out, Np), lambda i: (0, 0)),
        out_shape=jax.ShapeDtypeStruct((M_out, Np), jnp.float32),
        compiler_params=pltpu.CompilerParams(
            dimension_semantics=("arbitrary",),
            vmem_limit_bytes=32 * 1024 * 1024,
        ),
    )(patches.astype(jnp.bfloat16), w2p, b2p, A_bd.astype(jnp.bfloat16))
    return out[:, :C_out].reshape(B, 2 * H, 2 * W, C_out)


# ---------------------------------------------------------------------------
# Parameters (deterministic synthetic init, PyTorch-default-style uniform)
# ---------------------------------------------------------------------------
def _init_conv(key, c_out, c_in, k):
    kw, kb = jax.random.split(key)
    fan_in = c_in * k * k
    bound = 1.0 / jnp.sqrt(fan_in)
    w = jax.random.uniform(kw, (c_out, c_in, k, k), jnp.float32, -bound, bound)
    b = jax.random.uniform(kb, (c_out,), jnp.float32, -bound, bound)
    return w, b


def _init_convT(key, c_in, c_out, k):
    kw, kb = jax.random.split(key)
    fan_in = c_out * k * k   # PyTorch ConvTranspose2d fan_in uses weight.size(1)*k*k
    bound = 1.0 / jnp.sqrt(fan_in)
    w = jax.random.uniform(kw, (c_in, c_out, k, k), jnp.float32, -bound, bound)
    b = jax.random.uniform(kb, (c_out,), jnp.float32, -bound, bound)
    return w, b


def init_params(key):
    ks = jax.random.split(key, 6)
    p = {}
    p["e1_w"], p["e1_b"] = _init_conv(ks[0], 32, 3, 3)
    p["e2_w"], p["e2_b"] = _init_conv(ks[1], 64, 32, 3)
    p["e3_w"], p["e3_b"] = _init_conv(ks[2], 128, 64, 3)
    p["d1_w"], p["d1_b"] = _init_convT(ks[3], 128, 64, 3)
    p["d2_w"], p["d2_b"] = _init_convT(ks[4], 64, 32, 3)
    p["d3_w"], p["d3_b"] = _init_convT(ks[5], 32, 3, 3)
    return p


# ---------------------------------------------------------------------------
# Forward pass (matches Autoencoder.forward)
# ---------------------------------------------------------------------------
def autoencoder_forward(params, x_nchw):
    x = jnp.transpose(x_nchw, (0, 2, 3, 1))                           # NCHW -> NHWC once
    # encoder
    h = conv2d_nhwc(x, params["e1_w"], params["e1_b"], 2, 1, "relu")  # (B,16,16,32)
    h = conv2d_nhwc(h, params["e2_w"], params["e2_b"], 2, 1, "relu")  # (B, 8, 8,64)
    h = conv2d_nhwc(h, params["e3_w"], params["e3_b"], 2, 1, "relu")  # (B, 4, 4,128)
    h = maxpool2x2_nhwc(h)                                            # (B, 2, 2,128)
    # decoder
    h = conv_transpose2d_s2_nhwc(h, params["d1_w"], params["d1_b"], "relu")  # (B,4,4,64)
    h = conv_transpose2d_s2_nhwc(h, params["d2_w"], params["d2_b"], "relu")  # (B,8,8,32)
    h = convt3_upsample_tanh(h, params["d3_w"], params["d3_b"])              # (B,16,16,3)
    return jnp.transpose(h, (0, 3, 1, 2))                             # NHWC -> NCHW once


if __name__ == "__main__":
    key = jax.random.PRNGKey(0)
    k_param, k_x = jax.random.split(key)
    params = init_params(k_param)

    # Input in PyTorch NCHW layout: (batch=2, channels=3, 32, 32)
    x = jax.random.normal(k_x, (2, 3, 32, 32), jnp.float32)

    fwd = jax.jit(autoencoder_forward)
    out = jax.block_until_ready(fwd(params, x))

    # Sanity: 32 -> enc(16,8,4) -> pool 2 -> dec(4,8,8) -> upsample 16
    assert out.shape == (2, 3, 16, 16), out.shape
    assert bool(jnp.all(jnp.isfinite(out)))
    assert bool(jnp.all(jnp.abs(out) <= 1.0 + 1e-6))  # tanh range
    print("KERNEL_OK")
</pallas_src>

<mosaic_0001>
module attributes {stable_mosaic.version = 11 : i64} {
  func.func private @main(%arg0: i32) attributes {dimension_semantics = [#tpu.dimension_semantics<core_parallel>], iteration_bounds = array<i64: 2>, tpu.core_type = #tpu.core_type<sc_scalar_subcore>, window_params = []} {
    return
  }
}

module attributes {stable_mosaic.version = 11 : i64} {
  func.func private @main(%arg0: i32) attributes {dimension_semantics = [#tpu.dimension_semantics<core_parallel>], iteration_bounds = array<i64: 2>, tpu.core_type = #tpu.core_type<sc_scalar_subcore>, window_params = []} {
    return
  }
}

module attributes {stable_mosaic.version = 11 : i64} {
  func.func @_matmul_bias_act_kernel(%arg0: i32, %arg1: memref<256x32xbf16, #tpu.memory_space<vmem>>, %arg2: memref<32x128xbf16, #tpu.memory_space<vmem>>, %arg3: memref<1x128xf32, #tpu.memory_space<vmem>>, %arg4: memref<256x128xf32, #tpu.memory_space<vmem>>) attributes {dimension_semantics = [#tpu.dimension_semantics<parallel>], iteration_bounds = array<i64: 2>, scalar_prefetch = 0 : i64, scratch_operands = 0 : i64, tpu.core_type = #tpu.core_type<tc>, window_params = [{transform_indices = @transform_0, window_bounds = array<i64: 256, 32>}, {pipeline_mode = #tpu.pipeline_mode<synchronous>, transform_indices = @transform_1, window_bounds = array<i64: 32, 128>}, {pipeline_mode = #tpu.pipeline_mode<synchronous>, transform_indices = @transform_2, window_bounds = array<i64: 1, 128>}, {transform_indices = @transform_3, window_bounds = array<i64: 256, 128>}]} {
    %c0 = arith.constant 0 : index
    %c0_0 = arith.constant 0 : index
    %0 = vector.load %arg1[%c0, %c0_0] : memref<256x32xbf16, #tpu.memory_space<vmem>>, vector<256x32xbf16>
    %c0_1 = arith.constant 0 : index
    %c0_2 = arith.constant 0 : index
    %1 = vector.load %arg2[%c0_1, %c0_2] : memref<32x128xbf16, #tpu.memory_space<vmem>>, vector<32x128xbf16>
    %cst = arith.constant dense<0.000000e+00> : vector<256x128xf32>
    %2 = tpu.matmul %0, %1, %cst {dimension_numbers = #tpu.dot_dimension_numbers<[1], [0], [0], [1], [0, 0, 1, 1], [], []>} : vector<256x32xbf16>, vector<32x128xbf16>, vector<256x128xf32> -> vector<256x128xf32>
    %c0_3 = arith.constant 0 : index
    %c0_4 = arith.constant 0 : index
    %3 = vector.load %arg3[%c0_3, %c0_4] : memref<1x128xf32, #tpu.memory_space<vmem>>, vector<1x128xf32>
    %4 = vector.broadcast %3 : vector<1x128xf32> to vector<256x128xf32>
    %5 = arith.addf %2, %4 : vector<256x128xf32>
    %cst_5 = arith.constant 0.000000e+00 : f32
    %6 = vector.broadcast %cst_5 : f32 to vector<256x128xf32>
    %7 = arith.maximumf %5, %6 : vector<256x128xf32>
    %c0_6 = arith.constant 0 : index
    %c0_7 = arith.constant 0 : index
    %8 = vector.load %arg4[%c0_6, %c0_7] : memref<256x128xf32, #tpu.memory_space<vmem>>, vector<256x128xf32>
    tpu.vector_store %arg4[%c0_6, %c0_7], %7 {strides = array<i32>} : memref<256x128xf32, #tpu.memory_space<vmem>>, vector<256x128xf32>,
    return
  }
  func.func @transform_0(%arg0: i32) -> (i32, i32) {
    %c0_i32 = arith.constant 0 : i32
    %c0_i32_0 = arith.constant 0 : i32
    return %arg0, %c0_i32 : i32, i32
  }
  func.func @transform_1(%arg0: i32) -> (i32, i32) {
    %c0_i32 = arith.constant 0 : i32
    %c0_i32_0 = arith.constant 0 : i32
    %c0_i32_1 = arith.constant 0 : i32
    return %c0_i32, %c0_i32_0 : i32, i32
  }
  func.func @transform_2(%arg0: i32) -> (i32, i32) {
    %c0_i32 = arith.constant 0 : i32
    %c0_i32_0 = arith.constant 0 : i32
    %c0_i32_1 = arith.constant 0 : i32
    return %c0_i32, %c0_i32_0 : i32, i32
  }
  func.func @transform_3(%arg0: i32) -> (i32, i32) {
    %c0_i32 = arith.constant 0 : i32
    %c0_i32_0 = arith.constant 0 : i32
    return %arg0, %c0_i32 : i32, i32
  }
}

module attributes {stable_mosaic.version = 11 : i64} {
  func.func @_matmul_bias_act_kernel(%arg0: i32, %arg1: memref<128x288xbf16, #tpu.memory_space<vmem>>, %arg2: memref<288x128xbf16, #tpu.memory_space<vmem>>, %arg3: memref<1x128xf32, #tpu.memory_space<vmem>>, %arg4: memref<128x128xf32, #tpu.memory_space<vmem>>) attributes {dimension_semantics = [#tpu.dimension_semantics<parallel>], iteration_bounds = array<i64: 1>, scalar_prefetch = 0 : i64, scratch_operands = 0 : i64, tpu.core_type = #tpu.core_type<tc>, window_params = [{transform_indices = @transform_0, window_bounds = array<i64: 128, 288>}, {pipeline_mode = #tpu.pipeline_mode<synchronous>, transform_indices = @transform_1, window_bounds = array<i64: 288, 128>}, {pipeline_mode = #tpu.pipeline_mode<synchronous>, transform_indices = @transform_2, window_bounds = array<i64: 1, 128>}, {transform_indices = @transform_3, window_bounds = array<i64: 128, 128>}]} {
    %c0 = arith.constant 0 : index
    %c0_0 = arith.constant 0 : index
    %0 = vector.load %arg1[%c0, %c0_0] : memref<128x288xbf16, #tpu.memory_space<vmem>>, vector<128x288xbf16>
    %c0_1 = arith.constant 0 : index
    %c0_2 = arith.constant 0 : index
    %1 = vector.load %arg2[%c0_1, %c0_2] : memref<288x128xbf16, #tpu.memory_space<vmem>>, vector<288x128xbf16>
    %cst = arith.constant dense<0.000000e+00> : vector<128x128xf32>
    %2 = tpu.matmul %0, %1, %cst {dimension_numbers = #tpu.dot_dimension_numbers<[1], [0], [0], [1], [0, 0, 1, 1], [], []>} : vector<128x288xbf16>, vector<288x128xbf16>, vector<128x128xf32> -> vector<128x128xf32>
    %c0_3 = arith.constant 0 : index
    %c0_4 = arith.constant 0 : index
    %3 = vector.load %arg3[%c0_3, %c0_4] : memref<1x128xf32, #tpu.memory_space<vmem>>, vector<1x128xf32>
    %4 = vector.broadcast %3 : vector<1x128xf32> to vector<128x128xf32>
    %5 = arith.addf %2, %4 : vector<128x128xf32>
    %cst_5 = arith.constant 0.000000e+00 : f32
    %6 = vector.broadcast %cst_5 : f32 to vector<128x128xf32>
    %7 = arith.maximumf %5, %6 : vector<128x128xf32>
    %c0_6 = arith.constant 0 : index
    %c0_7 = arith.constant 0 : index
    %8 = vector.load %arg4[%c0_6, %c0_7] : memref<128x128xf32, #tpu.memory_space<vmem>>, vector<128x128xf32>
    tpu.vector_store %arg4[%c0_6, %c0_7], %7 {strides = array<i32>} : memref<128x128xf32, #tpu.memory_space<vmem>>, vector<128x128xf32>,
    return
  }
  func.func @transform_0(%arg0: i32) -> (i32, i32) {
    %c0_i32 = arith.constant 0 : i32
    %c0_i32_0 = arith.constant 0 : i32
    return %arg0, %c0_i32 : i32, i32
  }
  func.func @transform_1(%arg0: i32) -> (i32, i32) {
    %c0_i32 = arith.constant 0 : i32
    %c0_i32_0 = arith.constant 0 : i32
    %c0_i32_1 = arith.constant 0 : i32
    return %c0_i32, %c0_i32_0 : i32, i32
  }
  func.func @transform_2(%arg0: i32) -> (i32, i32) {
    %c0_i32 = arith.constant 0 : i32
    %c0_i32_0 = arith.constant 0 : i32
    %c0_i32_1 = arith.constant 0 : i32
    return %c0_i32, %c0_i32_0 : i32, i32
  }
  func.func @transform_3(%arg0: i32) -> (i32, i32) {
    %c0_i32 = arith.constant 0 : i32
    %c0_i32_0 = arith.constant 0 : i32
    return %arg0, %c0_i32 : i32, i32
  }
}

module attributes {stable_mosaic.version = 11 : i64} {
  func.func @_matmul_bias_act_kernel(%arg0: i32, %arg1: memref<32x576xbf16, #tpu.memory_space<vmem>>, %arg2: memref<576x128xbf16, #tpu.memory_space<vmem>>, %arg3: memref<1x128xf32, #tpu.memory_space<vmem>>, %arg4: memref<32x128xf32, #tpu.memory_space<vmem>>) attributes {dimension_semantics = [#tpu.dimension_semantics<parallel>], iteration_bounds = array<i64: 1>, scalar_prefetch = 0 : i64, scratch_operands = 0 : i64, tpu.core_type = #tpu.core_type<tc>, window_params = [{transform_indices = @transform_0, window_bounds = array<i64: 32, 576>}, {pipeline_mode = #tpu.pipeline_mode<synchronous>, transform_indices = @transform_1, window_bounds = array<i64: 576, 128>}, {pipeline_mode = #tpu.pipeline_mode<synchronous>, transform_indices = @transform_2, window_bounds = array<i64: 1, 128>}, {transform_indices = @transform_3, window_bounds = array<i64: 32, 128>}]} {
    %c0 = arith.constant 0 : index
    %c0_0 = arith.constant 0 : index
    %0 = vector.load %arg1[%c0, %c0_0] : memref<32x576xbf16, #tpu.memory_space<vmem>>, vector<32x576xbf16>
    %c0_1 = arith.constant 0 : index
    %c0_2 = arith.constant 0 : index
    %1 = vector.load %arg2[%c0_1, %c0_2] : memref<576x128xbf16, #tpu.memory_space<vmem>>, vector<576x128xbf16>
    %cst = arith.constant dense<0.000000e+00> : vector<32x128xf32>
    %2 = tpu.matmul %0, %1, %cst {dimension_numbers = #tpu.dot_dimension_numbers<[1], [0], [0], [1], [0, 0, 1, 1], [], []>} : vector<32x576xbf16>, vector<576x128xbf16>, vector<32x128xf32> -> vector<32x128xf32>
    %c0_3 = arith.constant 0 : index
    %c0_4 = arith.constant 0 : index
    %3 = vector.load %arg3[%c0_3, %c0_4] : memref<1x128xf32, #tpu.memory_space<vmem>>, vector<1x128xf32>
    %4 = vector.broadcast %3 : vector<1x128xf32> to vector<32x128xf32>
    %5 = arith.addf %2, %4 : vector<32x128xf32>
    %cst_5 = arith.constant 0.000000e+00 : f32
    %6 = vector.broadcast %cst_5 : f32 to vector<32x128xf32>
    %7 = arith.maximumf %5, %6 : vector<32x128xf32>
    %c0_6 = arith.constant 0 : index
    %c0_7 = arith.constant 0 : index
    %8 = vector.load %arg4[%c0_6, %c0_7] : memref<32x128xf32, #tpu.memory_space<vmem>>, vector<32x128xf32>
    tpu.vector_store %arg4[%c0_6, %c0_7], %7 {strides = array<i32>} : memref<32x128xf32, #tpu.memory_space<vmem>>, vector<32x128xf32>,
    return
  }
  func.func @transform_0(%arg0: i32) -> (i32, i32) {
    %c0_i32 = arith.constant 0 : i32
    %c0_i32_0 = arith.constant 0 : i32
    return %arg0, %c0_i32 : i32, i32
  }
  func.func @transform_1(%arg0: i32) -> (i32, i32) {
    %c0_i32 = arith.constant 0 : i32
    %c0_i32_0 = arith.constant 0 : i32
    %c0_i32_1 = arith.constant 0 : i32
    return %c0_i32, %c0_i32_0 : i32, i32
  }
  func.func @transform_2(%arg0: i32) -> (i32, i32) {
    %c0_i32 = arith.constant 0 : i32
    %c0_i32_0 = arith.constant 0 : i32
    %c0_i32_1 = arith.constant 0 : i32
    return %c0_i32, %c0_i32_0 : i32, i32
  }
  func.func @transform_3(%arg0: i32) -> (i32, i32) {
    %c0_i32 = arith.constant 0 : i32
    %c0_i32_0 = arith.constant 0 : i32
    return %arg0, %c0_i32 : i32, i32
  }
}

module attributes {stable_mosaic.version = 11 : i64} {
  func.func @_matmul_bias_act_kernel(%arg0: i32, %arg1: memref<8x512xbf16, #tpu.memory_space<vmem>>, %arg2: memref<512x256xbf16, #tpu.memory_space<vmem>>, %arg3: memref<1x256xf32, #tpu.memory_space<vmem>>, %arg4: memref<8x256xf32, #tpu.memory_space<vmem>>) attributes {dimension_semantics = [#tpu.dimension_semantics<parallel>], iteration_bounds = array<i64: 1>, scalar_prefetch = 0 : i64, scratch_operands = 0 : i64, tpu.core_type = #tpu.core_type<tc>, window_params = [{transform_indices = @transform_0, window_bounds = array<i64: 8, 512>}, {pipeline_mode = #tpu.pipeline_mode<synchronous>, transform_indices = @transform_1, window_bounds = array<i64: 512, 256>}, {pipeline_mode = #tpu.pipeline_mode<synchronous>, transform_indices = @transform_2, window_bounds = array<i64: 1, 256>}, {transform_indices = @transform_3, window_bounds = array<i64: 8, 256>}]} {
    %c0 = arith.constant 0 : index
    %c0_0 = arith.constant 0 : index
    %0 = vector.load %arg1[%c0, %c0_0] : memref<8x512xbf16, #tpu.memory_space<vmem>>, vector<8x512xbf16>
    %c0_1 = arith.constant 0 : index
    %c0_2 = arith.constant 0 : index
    %1 = vector.load %arg2[%c0_1, %c0_2] : memref<512x256xbf16, #tpu.memory_space<vmem>>, vector<512x256xbf16>
    %cst = arith.constant dense<0.000000e+00> : vector<8x256xf32>
    %2 = tpu.matmul %0, %1, %cst {dimension_numbers = #tpu.dot_dimension_numbers<[1], [0], [0], [1], [0, 0, 1, 1], [], []>} : vector<8x512xbf16>, vector<512x256xbf16>, vector<8x256xf32> -> vector<8x256xf32>
    %c0_3 = arith.constant 0 : index
    %c0_4 = arith.constant 0 : index
    %3 = vector.load %arg3[%c0_3, %c0_4] : memref<1x256xf32, #tpu.memory_space<vmem>>, vector<1x256xf32>
    %4 = vector.broadcast %3 : vector<1x256xf32> to vector<8x256xf32>
    %5 = arith.addf %2, %4 : vector<8x256xf32>
    %cst_5 = arith.constant 0.000000e+00 : f32
    %6 = vector.broadcast %cst_5 : f32 to vector<8x256xf32>
    %7 = arith.maximumf %5, %6 : vector<8x256xf32>
    %c0_6 = arith.constant 0 : index
    %c0_7 = arith.constant 0 : index
    %8 = vector.load %arg4[%c0_6, %c0_7] : memref<8x256xf32, #tpu.memory_space<vmem>>, vector<8x256xf32>
    tpu.vector_store %arg4[%c0_6, %c0_7], %7 {strides = array<i32>} : memref<8x256xf32, #tpu.memory_space<vmem>>, vector<8x256xf32>,
    return
  }
  func.func @transform_0(%arg0: i32) -> (i32, i32) {
    %c0_i32 = arith.constant 0 : i32
    %c0_i32_0 = arith.constant 0 : i32
    return %arg0, %c0_i32 : i32, i32
  }
  func.func @transform_1(%arg0: i32) -> (i32, i32) {
    %c0_i32 = arith.constant 0 : i32
    %c0_i32_0 = arith.constant 0 : i32
    %c0_i32_1 = arith.constant 0 : i32
    return %c0_i32, %c0_i32_0 : i32, i32
  }
  func.func @transform_2(%arg0: i32) -> (i32, i32) {
    %c0_i32 = arith.constant 0 : i32
    %c0_i32_0 = arith.constant 0 : i32
    %c0_i32_1 = arith.constant 0 : i32
    return %c0_i32, %c0_i32_0 : i32, i32
  }
  func.func @transform_3(%arg0: i32) -> (i32, i32) {
    %c0_i32 = arith.constant 0 : i32
    %c0_i32_0 = arith.constant 0 : i32
    return %arg0, %c0_i32 : i32, i32
  }
}

module attributes {stable_mosaic.version = 11 : i64} {
  func.func @_matmul_bias_act_kernel(%arg0: i32, %arg1: memref<32x256xbf16, #tpu.memory_space<vmem>>, %arg2: memref<256x128xbf16, #tpu.memory_space<vmem>>, %arg3: memref<1x128xf32, #tpu.memory_space<vmem>>, %arg4: memref<32x128xf32, #tpu.memory_space<vmem>>) attributes {dimension_semantics = [#tpu.dimension_semantics<parallel>], iteration_bounds = array<i64: 1>, scalar_prefetch = 0 : i64, scratch_operands = 0 : i64, tpu.core_type = #tpu.core_type<tc>, window_params = [{transform_indices = @transform_0, window_bounds = array<i64: 32, 256>}, {pipeline_mode = #tpu.pipeline_mode<synchronous>, transform_indices = @transform_1, window_bounds = array<i64: 256, 128>}, {pipeline_mode = #tpu.pipeline_mode<synchronous>, transform_indices = @transform_2, window_bounds = array<i64: 1, 128>}, {transform_indices = @transform_3, window_bounds = array<i64: 32, 128>}]} {
    %c0 = arith.constant 0 : index
    %c0_0 = arith.constant 0 : index
    %0 = vector.load %arg1[%c0, %c0_0] : memref<32x256xbf16, #tpu.memory_space<vmem>>, vector<32x256xbf16>
    %c0_1 = arith.constant 0 : index
    %c0_2 = arith.constant 0 : index
    %1 = vector.load %arg2[%c0_1, %c0_2] : memref<256x128xbf16, #tpu.memory_space<vmem>>, vector<256x128xbf16>
    %cst = arith.constant dense<0.000000e+00> : vector<32x128xf32>
    %2 = tpu.matmul %0, %1, %cst {dimension_numbers = #tpu.dot_dimension_numbers<[1], [0], [0], [1], [0, 0, 1, 1], [], []>} : vector<32x256xbf16>, vector<256x128xbf16>, vector<32x128xf32> -> vector<32x128xf32>
    %c0_3 = arith.constant 0 : index
    %c0_4 = arith.constant 0 : index
    %3 = vector.load %arg3[%c0_3, %c0_4] : memref<1x128xf32, #tpu.memory_space<vmem>>, vector<1x128xf32>
    %4 = vector.broadcast %3 : vector<1x128xf32> to vector<32x128xf32>
    %5 = arith.addf %2, %4 : vector<32x128xf32>
    %cst_5 = arith.constant 0.000000e+00 : f32
    %6 = vector.broadcast %cst_5 : f32 to vector<32x128xf32>
    %7 = arith.maximumf %5, %6 : vector<32x128xf32>
    %c0_6 = arith.constant 0 : index
    %c0_7 = arith.constant 0 : index
    %8 = vector.load %arg4[%c0_6, %c0_7] : memref<32x128xf32, #tpu.memory_space<vmem>>, vector<32x128xf32>
    tpu.vector_store %arg4[%c0_6, %c0_7], %7 {strides = array<i32>} : memref<32x128xf32, #tpu.memory_space<vmem>>, vector<32x128xf32>,
    return
  }
  func.func @transform_0(%arg0: i32) -> (i32, i32) {
    %c0_i32 = arith.constant 0 : i32
    %c0_i32_0 = arith.constant 0 : i32
    return %arg0, %c0_i32 : i32, i32
  }
  func.func @transform_1(%arg0: i32) -> (i32, i32) {
    %c0_i32 = arith.constant 0 : i32
    %c0_i32_0 = arith.constant 0 : i32
    %c0_i32_1 = arith.constant 0 : i32
    return %c0_i32, %c0_i32_0 : i32, i32
  }
  func.func @transform_2(%arg0: i32) -> (i32, i32) {
    %c0_i32 = arith.constant 0 : i32
    %c0_i32_0 = arith.constant 0 : i32
    %c0_i32_1 = arith.constant 0 : i32
    return %c0_i32, %c0_i32_0 : i32, i32
  }
  func.func @transform_3(%arg0: i32) -> (i32, i32) {
    %c0_i32 = arith.constant 0 : i32
    %c0_i32_0 = arith.constant 0 : i32
    return %arg0, %c0_i32 : i32, i32
  }
}

module attributes {stable_mosaic.version = 11 : i64} {
  func.func @_convt_up_tanh_kernel(%arg0: i32, %arg1: memref<128x288xbf16, #tpu.memory_space<vmem>>, %arg2: memref<288x128xbf16, #tpu.memory_space<vmem>>, %arg3: memref<1x128xf32, #tpu.memory_space<vmem>>, %arg4: memref<512x128xbf16, #tpu.memory_space<vmem>>, %arg5: memref<512x128xf32, #tpu.memory_space<vmem>>) attributes {dimension_semantics = [#tpu.dimension_semantics<arbitrary>], iteration_bounds = array<i64: 1>, scalar_prefetch = 0 : i64, scratch_operands = 0 : i64, tpu.core_type = #tpu.core_type<tc>, window_params = [{pipeline_mode = #tpu.pipeline_mode<synchronous>, transform_indices = @transform_0, window_bounds = array<i64: 128, 288>}, {pipeline_mode = #tpu.pipeline_mode<synchronous>, transform_indices = @transform_1, window_bounds = array<i64: 288, 128>}, {pipeline_mode = #tpu.pipeline_mode<synchronous>, transform_indices = @transform_2, window_bounds = array<i64: 1, 128>}, {pipeline_mode = #tpu.pipeline_mode<synchronous>, transform_indices = @transform_3, window_bounds = array<i64: 512, 128>}, {pipeline_mode = #tpu.pipeline_mode<synchronous>, transform_indices = @transform_4, window_bounds = array<i64: 512, 128>}]} {
    %c0 = arith.constant 0 : index
    %c0_0 = arith.constant 0 : index
    %0 = vector.load %arg1[%c0, %c0_0] : memref<128x288xbf16, #tpu.memory_space<vmem>>, vector<128x288xbf16>
    %c0_1 = arith.constant 0 : index
    %c0_2 = arith.constant 0 : index
    %1 = vector.load %arg2[%c0_1, %c0_2] : memref<288x128xbf16, #tpu.memory_space<vmem>>, vector<288x128xbf16>
    %cst = arith.constant dense<0.000000e+00> : vector<128x128xf32>
    %2 = tpu.matmul %0, %1, %cst {dimension_numbers = #tpu.dot_dimension_numbers<[1], [0], [0], [1], [0, 0, 1, 1], [], []>} : vector<128x288xbf16>, vector<288x128xbf16>, vector<128x128xf32> -> vector<128x128xf32>
    %c0_3 = arith.constant 0 : index
    %c0_4 = arith.constant 0 : index
    %3 = vector.load %arg3[%c0_3, %c0_4] : memref<1x128xf32, #tpu.memory_space<vmem>>, vector<1x128xf32>
    %4 = vector.broadcast %3 : vector<1x128xf32> to vector<128x128xf32>
    %5 = arith.addf %2, %4 : vector<128x128xf32>
    %cst_5 = arith.constant 0.000000e+00 : f32
    %6 = vector.broadcast %cst_5 : f32 to vector<128x128xf32>
    %7 = arith.maximumf %5, %6 : vector<128x128xf32>
    %c0_6 = arith.constant 0 : index
    %c0_7 = arith.constant 0 : index
    %8 = vector.load %arg4[%c0_6, %c0_7] : memref<512x128xbf16, #tpu.memory_space<vmem>>, vector<512x128xbf16>
    %9 = arith.truncf %7 : vector<128x128xf32> to vector<128x128xbf16>
    %cst_8 = arith.constant dense<0.000000e+00> : vector<512x128xf32>
    %10 = tpu.matmul %8, %9, %cst_8 {dimension_numbers = #tpu.dot_dimension_numbers<[1], [0], [0], [1], [0, 0, 1, 1], [], []>} : vector<512x128xbf16>, vector<128x128xbf16>, vector<512x128xf32> -> vector<512x128xf32>
    %11 = math.tanh %10 : vector<512x128xf32>
    %c0_9 = arith.constant 0 : index
    %c0_10 = arith.constant 0 : index
    %12 = vector.load %arg5[%c0_9, %c0_10] : memref<512x128xf32, #tpu.memory_space<vmem>>, vector<512x128xf32>
    tpu.vector_store %arg5[%c0_9, %c0_10], %11 {strides = array<i32>} : memref<512x128xf32, #tpu.memory_space<vmem>>, vector<512x128xf32>,
    return
  }
  func.func @transform_0(%arg0: i32) -> (i32, i32) {
    %c0_i32 = arith.constant 0 : i32
    %c0_i32_0 = arith.constant 0 : i32
    %c0_i32_1 = arith.constant 0 : i32
    return %c0_i32, %c0_i32_0 : i32, i32
  }
  func.func @transform_1(%arg0: i32) -> (i32, i32) {
    %c0_i32 = arith.constant 0 : i32
    %c0_i32_0 = arith.constant 0 : i32
    %c0_i32_1 = arith.constant 0 : i32
    return %c0_i32, %c0_i32_0 : i32, i32
  }
  func.func @transform_2(%arg0: i32) -> (i32, i32) {
    %c0_i32 = arith.constant 0 : i32
    %c0_i32_0 = arith.constant 0 : i32
    %c0_i32_1 = arith.constant 0 : i32
    return %c0_i32, %c0_i32_0 : i32, i32
  }
  func.func @transform_3(%arg0: i32) -> (i32, i32) {
    %c0_i32 = arith.constant 0 : i32
    %c0_i32_0 = arith.constant 0 : i32
    %c0_i32_1 = arith.constant 0 : i32
    return %c0_i32, %c0_i32_0 : i32, i32
  }
  func.func @transform_4(%arg0: i32) -> (i32, i32) {
    %c0_i32 = arith.constant 0 : i32
    %c0_i32_0 = arith.constant 0 : i32
    %c0_i32_1 = arith.constant 0 : i32
    return %c0_i32, %c0_i32_0 : i32, i32
  }
}

</mosaic_0001>

<bundles_post_ra>
// kernel: autoencoder_forward.6
= control target key start
LH: loop header
LB: loop body
LE: loop exit
PB: predicated region body
PF: predicated region fallthrough
CT: control target
= control target key end

     0   :  { %s798_s12 = smov 0   ;;  %s930_s0 = inlined_call_operand.vmem [shape: bf16[512,32], index: 0, kind: input, shape index: {}]   ;;  %s931_s1 = inlined_call_operand.vmem [shape: bf16[32,128], index: 1, kind: input, shape index: {}]   ;;  %s932_s2 = inlined_call_operand.vmem [shape: f32[1,128], index: 2, kind: input, shape index: {}]   ;;  %s933_s3 = inlined_call_operand.vmem [shape: f32[512,128], index: 3, kind: output, shape index: {}]  }
   0x1 LB: > { %s640_s13 = sadd.s32 4294967295, %s776_s12   ;;  %p644_p0 = scmp.ge.s32.totalorder %s776_s12, 1  ;;  %s776_s12 = sphi %s798_s12, %s13_s12  }
   0x2   : > { %p138_p1 = scmp.lt.s32.totalorder %s776_s12, 3 }
   0x4   : > { %p139_p2 = pnand %p644_p0, %p138_p1 }
   0x5   : > { %v752_v0 = vld [vmem:[%s931_s1] sm:$0xff] (!%p139_p2)   ;;  %s645_s16 = sshll.u32 (!%p139_p2), %s640_s13, 5  ;;  %v753_v1 = vld [vmem:[%s931_s1 + $0x8] sm:$0xff] (!%p139_p2)   ;;  %vm310_vm0 = vcmask (!%p139_p2), 261120  }
   0x6   : > { %142 = sbr.rel (%p139_p2) target bundleno = 263 (0x107), region = 32  ;;  %p163_p3 = scmp.lt.s32.totalorder (!%p139_p2), %s645_s16, 63  ;;  %704 = vmatprep.subr.bf16.mxu0 (!%p139_p2), %v752_v0  ;;  %740 = vmatprep.subr.bf16.mxu1 (!%p139_p2), %v752_v0  ;;  %v855_v18 = vld [vmem:[%s932_s2] ss:$0 sm:$0xff] (!%p139_p2) }
   0x7   : > { %705 = vmatpush3.bf16.msra.mxu0 (!%p139_p2), %v752_v0  ;;  %742 = vmatpush3.bf16.msra.mxu1 (!%p139_p2), %v752_v0 }
   0x8   : > { %706 = vmatprep.subr.bf16.mxu0 (!%p139_p2), %v753_v1  ;;  %741 = vmatprep.subr.bf16.mxu1 (!%p139_p2), %v753_v1 }
   0xb   : > { %707 = vmatpush3.bf16.msra.mxu0 (!%p139_p2), %v753_v1  ;;  %743 = vmatpush3.bf16.msra.mxu1 (!%p139_p2), %v753_v1 }
   0xd   : > { %s935_s16 = smov (!%p163_p3, %s645_s16), 63 }
   0xe   : > { %s646_s19 = sshll.u32 %s935_s16, 2  ;;  %s648_s25 = sshll.u32 %s935_s16, 3 }
   0xf   : > { %s818_s22 = scalar_lea.vmem %s930_s0, %s646_s19  ;;  %s862_s28 = scalar_lea.vmem %s933_s3, %s648_s25 }
  0x10   : > { %v754_v2 = vld [vmem:[%s818_s22] sm:$0xff]   ;;  %v756_v4 = vld [vmem:[%s818_s22 + $0x8] sm:$0xff]   ;;  %v758_v6 = vld [vmem:[%s818_s22 + $0x10] sm:$0xff]  }
  0x11   : > { %v755_v3 = vld [vmem:[%s818_s22 + $0x40] sm:$0xff]   ;;  %708 = vmatprep.mubr.msk.bf16.mxu0 %vm310_vm0, %v754_v2  ;;  %v757_v5 = vld [vmem:[%s818_s22 + $0x48] sm:$0xff]   ;;  %v759_v7 = vld [vmem:[%s818_s22 + $0x50] sm:$0xff]  }
  0x12   : > { %724 = vmatprep.mubr.msk.bf16.mxu1 %vm310_vm0, %v755_v3  ;;  %709 = vmatmul.mubr.msk.bf16.vlgmr.msra.gmra.mrb[0].mxu0 %vm310_vm0, %v756_v4  ;;  %v760_v8 = vld [vmem:[%s818_s22 + $0x18] sm:$0xff]   ;;  %v762_v10 = vld [vmem:[%s818_s22 + $0x20] sm:$0xff]   ;;  %v764_v12 = vld [vmem:[%s818_s22 + $0x28] sm:$0xff]  }
  0x13   : > { %725 = vmatmul.mubr.msk.bf16.vlgmr.msra.gmra.mrb[0].mxu1 %vm310_vm0, %v757_v5  ;;  %712 = vmatprep.mubr.msk.bf16.mxu0 %vm310_vm0, %v758_v6  ;;  %v761_v9 = vld [vmem:[%s818_s22 + $0x58] sm:$0xff]   ;;  %v763_v11 = vld [vmem:[%s818_s22 + $0x60] sm:$0xff]   ;;  %v765_v13 = vld [vmem:[%s818_s22 + $0x68] sm:$0xff]  }
  0x14   : > { %728 = vmatprep.mubr.msk.bf16.mxu1 %vm310_vm0, %v759_v7  ;;  %v766_v14 = vld [vmem:[%s818_s22 + $0x30] sm:$0xff]   ;;  %v768_v16 = vld [vmem:[%s818_s22 + $0x38] sm:$0xff]  }
  0x15   : > { %v767_v15 = vld [vmem:[%s818_s22 + $0x70] sm:$0xff]   ;;  %v769_v17 = vld [vmem:[%s818_s22 + $0x78] sm:$0xff]  }
  0x1a   : > { %713 = vmatmul.mubr.msk.bf16.gmra.mrb[4].mxu0 %vm310_vm0, %v760_v8 }
  0x1b   : > { %729 = vmatmul.mubr.msk.bf16.gmra.mrb[4].mxu1 %vm310_vm0, %v761_v9  ;;  %716 = vmatprep.mubr.msk.bf16.mxu0 %vm310_vm0, %v762_v10 }
  0x1c   : > { %732 = vmatprep.mubr.msk.bf16.mxu1 %vm310_vm0, %v763_v11 }
  0x22   : > { %717 = vmatmul.mubr.msk.bf16.gmra.mrb[8].mxu0 %vm310_vm0, %v764_v12 }
  0x23   : > { %733 = vmatmul.mubr.msk.bf16.gmra.mrb[8].mxu1 %vm310_vm0, %v765_v13  ;;  %720 = vmatprep.mubr.msk.bf16.mxu0 %vm310_vm0, %v766_v14 }
  0x24   : > { %736 = vmatprep.mubr.msk.bf16.mxu1 %vm310_vm0, %v767_v15 }
  0x2a   : > { %721 = vmatmul.mubr.msk.bf16.gmra.mrb[12].mxu0 %vm310_vm0, %v768_v16 }
  0x2b   : > { %737 = vmatmul.mubr.msk.bf16.gmra.mrb[12].mxu1 %vm310_vm0, %v769_v17 }
  0xe5   : > { %v710_v19 = vpop.f32.mrb[0].mxu0 }
  0xe6   : > { %v402_v20 = vadd.f32 %v710_v19, %v855_v18  ;;  %v726_v21 = vpop.f32.mrb[0].mxu1  ;;  %v393_v22 = vpop.f32.mrb[1].mxu0 }
  0xe7   : > { %v466_v23 = vadd.f32 %v726_v21, %v855_v18  ;;  %v394_v24 = vadd.f32 %v855_v18, %v393_v22  ;;  %v457_v25 = vpop.f32.mrb[1].mxu1  ;;  %v711_v26 = vpop.f32.mrb[2].mxu0 }
  0xe8   : > { %v522_v27 = vmax.f32 %v402_v20, 0.0  ;;  %v458_v28 = vadd.f32 %v855_v18, %v457_v25  ;;  %v405_v29 = vadd.f32 %v711_v26, %v855_v18  ;;  %v727_v30 = vpop.f32.mrb[2].mxu1  ;;  %v396_v31 = vpop.f32.mrb[3].mxu0 }
  0xe9   : > { %v538_v32 = vmax.f32 %v466_v23, 0.0  ;;  %v520_v33 = vmax.f32 %v394_v24, 0.0  ;;  %v469_v34 = vadd.f32 %v727_v30, %v855_v18  ;;  %v397_v35 = vadd.f32 %v855_v18, %v396_v31  ;;  %v460_v36 = vpop.f32.mrb[3].mxu1 }
  0xea   : > { %554 = vst [vmem:[%s862_s28 + $0x10] sm:$0xff] %v522_v27  ;;  %v536_v37 = vmax.f32 %v458_v28, 0.0  ;;  %v523_v38 = vmax.f32 %v405_v29, 0.0  ;;  %v461_v39 = vadd.f32 %v855_v18, %v460_v36 }
  0xeb   : > { %570 = vst [vmem:[%s862_s28 + $0x90] sm:$0xff] %v538_v32  ;;  %552 = vst [vmem:[%s862_s28] sm:$0xff] %v520_v33  ;;  %v539_v40 = vmax.f32 %v469_v34, 0.0  ;;  %v521_v41 = vmax.f32 %v397_v35, 0.0 }
  0xec   : > { %568 = vst [vmem:[%s862_s28 + $0x80] sm:$0xff] %v536_v37  ;;  %555 = vst [vmem:[%s862_s28 + $0x18] sm:$0xff] %v523_v38  ;;  %v537_v42 = vmax.f32 %v461_v39, 0.0 }
  0xed   : > { %571 = vst [vmem:[%s862_s28 + $0x98] sm:$0xff] %v539_v40  ;;  %553 = vst [vmem:[%s862_s28 + $0x8] sm:$0xff] %v521_v41  ;;  %v714_v43 = vpop.f32.mrb[4].mxu0 }
  0xee   : > { %569 = vst [vmem:[%s862_s28 + $0x88] sm:$0xff] %v537_v42  ;;  %v418_v44 = vadd.f32 %v714_v43, %v855_v18  ;;  %v730_v45 = vpop.f32.mrb[4].mxu1  ;;  %v409_v46 = vpop.f32.mrb[5].mxu0 }
  0xef   : > { %v482_v47 = vadd.f32 %v730_v45, %v855_v18  ;;  %v410_v48 = vadd.f32 %v855_v18, %v409_v46  ;;  %v473_v49 = vpop.f32.mrb[5].mxu1  ;;  %v715_v50 = vpop.f32.mrb[6].mxu0 }
  0xf0   : > { %v526_v51 = vmax.f32 %v418_v44, 0.0  ;;  %v474_v52 = vadd.f32 %v855_v18, %v473_v49  ;;  %v421_v53 = vadd.f32 %v715_v50, %v855_v18  ;;  %v731_v54 = vpop.f32.mrb[6].mxu1  ;;  %v412_v55 = vpop.f32.mrb[7].mxu0 }
  0xf1   : > { %v542_v56 = vmax.f32 %v482_v47, 0.0  ;;  %v524_v57 = vmax.f32 %v410_v48, 0.0  ;;  %v485_v58 = vadd.f32 %v731_v54, %v855_v18  ;;  %v413_v59 = vadd.f32 %v855_v18, %v412_v55  ;;  %v476_v60 = vpop.f32.mrb[7].mxu1 }
  0xf2   : > { %558 = vst [vmem:[%s862_s28 + $0x30] sm:$0xff] %v526_v51  ;;  %v540_v61 = vmax.f32 %v474_v52, 0.0  ;;  %v527_v62 = vmax.f32 %v421_v53, 0.0  ;;  %v477_v63 = vadd.f32 %v855_v18, %v476_v60 }
  0xf3   : > { %574 = vst [vmem:[%s862_s28 + $0xb0] sm:$0xff] %v542_v56  ;;  %556 = vst [vmem:[%s862_s28 + $0x20] sm:$0xff] %v524_v57  ;;  %v543_v0 = vmax.f32 %v485_v58, 0.0  ;;  %v525_v1 = vmax.f32 %v413_v59, 0.0 }
  0xf4   : > { %572 = vst [vmem:[%s862_s28 + $0xa0] sm:$0xff] %v540_v61  ;;  %559 = vst [vmem:[%s862_s28 + $0x38] sm:$0xff] %v527_v62  ;;  %v541_v2 = vmax.f32 %v477_v63, 0.0 }
  0xf5   : > { %575 = vst [vmem:[%s862_s28 + $0xb8] sm:$0xff] %v543_v0  ;;  %557 = vst [vmem:[%s862_s28 + $0x28] sm:$0xff] %v525_v1  ;;  %v718_v3 = vpop.f32.mrb[8].mxu0 }
  0xf6   : > { %573 = vst [vmem:[%s862_s28 + $0xa8] sm:$0xff] %v541_v2  ;;  %v434_v4 = vadd.f32 %v718_v3, %v855_v18  ;;  %v734_v5 = vpop.f32.mrb[8].mxu1  ;;  %v425_v6 = vpop.f32.mrb[9].mxu0 }
  0xf7   : > { %v498_v7 = vadd.f32 %v734_v5, %v855_v18  ;;  %v426_v8 = vadd.f32 %v855_v18, %v425_v6  ;;  %v489_v9 = vpop.f32.mrb[9].mxu1  ;;  %v719_v10 = vpop.f32.mrb[10].mxu0 }
  0xf8   : > { %v530_v11 = vmax.f32 %v434_v4, 0.0  ;;  %v490_v12 = vadd.f32 %v855_v18, %v489_v9  ;;  %v437_v13 = vadd.f32 %v719_v10, %v855_v18  ;;  %v735_v14 = vpop.f32.mrb[10].mxu1  ;;  %v428_v15 = vpop.f32.mrb[11].mxu0 }
  0xf9   : > { %v546_v16 = vmax.f32 %v498_v7, 0.0  ;;  %v528_v17 = vmax.f32 %v426_v8, 0.0  ;;  %v501_v19 = vadd.f32 %v735_v14, %v855_v18  ;;  %v429_v20 = vadd.f32 %v855_v18, %v428_v15  ;;  %v492_v21 = vpop.f32.mrb[11].mxu1 }
  0xfa   : > { %562 = vst [vmem:[%s862_s28 + $0x50] sm:$0xff] %v530_v11  ;;  %v544_v22 = vmax.f32 %v490_v12, 0.0  ;;  %v531_v23 = vmax.f32 %v437_v13, 0.0  ;;  %v493_v24 = vadd.f32 %v855_v18, %v492_v21 }
  0xfb   : > { %578 = vst [vmem:[%s862_s28 + $0xd0] sm:$0xff] %v546_v16  ;;  %560 = vst [vmem:[%s862_s28 + $0x40] sm:$0xff] %v528_v17  ;;  %v547_v25 = vmax.f32 %v501_v19, 0.0  ;;  %v529_v26 = vmax.f32 %v429_v20, 0.0 }
  0xfc   : > { %576 = vst [vmem:[%s862_s28 + $0xc0] sm:$0xff] %v544_v22  ;;  %563 = vst [vmem:[%s862_s28 + $0x58] sm:$0xff] %v531_v23  ;;  %v545_v27 = vmax.f32 %v493_v24, 0.0 }
  0xfd   : > { %579 = vst [vmem:[%s862_s28 + $0xd8] sm:$0xff] %v547_v25  ;;  %561 = vst [vmem:[%s862_s28 + $0x48] sm:$0xff] %v529_v26  ;;  %v722_v28 = vpop.f32.mrb[12].mxu0 }
  0xfe   : > { %577 = vst [vmem:[%s862_s28 + $0xc8] sm:$0xff] %v545_v27  ;;  %v450_v29 = vadd.f32 %v722_v28, %v855_v18  ;;  %v738_v30 = vpop.f32.mrb[12].mxu1  ;;  %v441_v31 = vpop.f32.mrb[13].mxu0 }
  0xff   : > { %v514_v32 = vadd.f32 %v738_v30, %v855_v18  ;;  %v442_v33 = vadd.f32 %v855_v18, %v441_v31  ;;  %v505_v34 = vpop.f32.mrb[13].mxu1  ;;  %v723_v35 = vpop.f32.mrb[14].mxu0 }
 0x100   : > { %v534_v36 = vmax.f32 %v450_v29, 0.0  ;;  %v506_v37 = vadd.f32 %v855_v18, %v505_v34  ;;  %v453_v38 = vadd.f32 %v723_v35, %v855_v18  ;;  %v739_v39 = vpop.f32.mrb[14].mxu1  ;;  %v444_v40 = vpop.f32.mrb[15].mxu0 }
 0x101   : > { %v550_v41 = vmax.f32 %v514_v32, 0.0  ;;  %v532_v42 = vmax.f32 %v442_v33, 0.0  ;;  %v517_v43 = vadd.f32 %v739_v39, %v855_v18  ;;  %v445_v44 = vadd.f32 %v855_v18, %v444_v40  ;;  %v508_v45 = vpop.f32.mrb[15].mxu1 }
 0x102   : > { %566 = vst [vmem:[%s862_s28 + $0x70] sm:$0xff] %v534_v36  ;;  %v548_v46 = vmax.f32 %v506_v37, 0.0  ;;  %v535_v47 = vmax.f32 %v453_v38, 0.0  ;;  %v509_v48 = vadd.f32 %v855_v18, %v508_v45 }
 0x103   : > { %582 = vst [vmem:[%s862_s28 + $0xf0] sm:$0xff] %v550_v41  ;;  %564 = vst [vmem:[%s862_s28 + $0x60] sm:$0xff] %v532_v42  ;;  %v551_v49 = vmax.f32 %v517_v43, 0.0  ;;  %v533_v50 = vmax.f32 %v445_v44, 0.0 }
 0x104   : > { %580 = vst [vmem:[%s862_s28 + $0xe0] sm:$0xff] %v548_v46  ;;  %567 = vst [vmem:[%s862_s28 + $0x78] sm:$0xff] %v535_v47  ;;  %v549_v51 = vmax.f32 %v509_v48, 0.0 }
 0x105   : > { %583 = vst [vmem:[%s862_s28 + $0xf8] sm:$0xff] %v551_v49  ;;  %565 = vst [vmem:[%s862_s28 + $0x68] sm:$0xff] %v533_v50 }
 0x106   : > { %581 = vst [vmem:[%s862_s28 + $0xe8] sm:$0xff] %v549_v51 }
 0x107 PF: > { %s13_s12 = sadd.s32 1, %s776_s12  }
 0x108   : > { %p10_p4 = scmp.ge.s32.totalorder %s13_s12, 4  }
 0x10a   :  { %12 = sbr.rel (!%p10_p4) target bundleno = 1 (0x1), region = 62 }

// kernel: autoencoder_forward.7
= control target key start
LH: loop header
LB: loop body
LE: loop exit
PB: predicated region body
PF: predicated region fallthrough
CT: control target
= control target key end

     0   :  { %vm318_vm0 = vcmask 261120   ;;  %s1019_s1 = inlined_call_operand.vmem [shape: bf16[288,128], index: 1, kind: input, shape index: {}]   ;;  %s1020_s0 = inlined_call_operand.vmem [shape: bf16[128,288], index: 0, kind: input, shape index: {}]   ;;  %s1021_s2 = inlined_call_operand.vmem [shape: f32[1,128], index: 2, kind: input, shape index: {}]   ;;  %s1022_s3 = inlined_call_operand.vmem [shape: f32[128,128], index: 3, kind: output, shape index: {}]  }
   0x1   :  { %v734_v0 = vld [vmem:[%s1019_s1 + $0x40] sm:$0xff]   ;;  %v736_v2 = vld [vmem:[%s1019_s1 + $0x48] sm:$0xff]   ;;  %v738_v4 = vld [vmem:[%s1019_s1 + $0x50] sm:$0xff]  }
   0x2   :  { %v735_v1 = vld [vmem:[%s1019_s1] sm:$0xff]   ;;  %624 = vmatprep.subr.bf16.mxu0 %v734_v0  ;;  %718 = vmatprep.subr.bf16.mxu1 %v734_v0  ;;  %v737_v3 = vld [vmem:[%s1019_s1 + $0x8] sm:$0xff]   ;;  %v739_v5 = vld [vmem:[%s1019_s1 + $0x10] sm:$0xff]  }
   0x3   :  { %625 = vmatpush3.bf16.msra.mxu0 %v735_v1  ;;  %726 = vmatpush3.bf16.msra.mxu1 %v735_v1  ;;  %v740_v6 = vld [vmem:[%s1019_s1 + $0x58] sm:$0xff]   ;;  %v742_v8 = vld [vmem:[%s1019_s1 + $0x60] sm:$0xff]   ;;  %v744_v10 = vld [vmem:[%s1019_s1 + $0x68] sm:$0xff]  }
   0x4   :  { %626 = vmatprep.subr.bf16.mxu0 %v736_v2  ;;  %719 = vmatprep.subr.bf16.mxu1 %v736_v2  ;;  %v741_v7 = vld [vmem:[%s1019_s1 + $0x18] sm:$0xff]   ;;  %v743_v9 = vld [vmem:[%s1019_s1 + $0x20] sm:$0xff]   ;;  %v745_v13 = vld [vmem:[%s1019_s1 + $0x28] sm:$0xff]  }
   0x5   :  { %v752_v11 = vld [vmem:[%s1020_s0 + $0x4] ss:$12 sps:$4 sm:$0xff]   ;;  %v755_v12 = vld [vmem:[%s1020_s0 + $0x94] ss:$12 sps:$4 sm:$0xff]   ;;  %v748_v16 = vld [vmem:[%s1019_s1 + $0x78] sm:$0xff]  }
   0x6   :  { %v746_v14 = vld [vmem:[%s1019_s1 + $0x70] sm:$0xff]   ;;  %375 = vmatprep.mubr.bf16.mxu0 %v752_v11  ;;  %423 = vmatprep.mubr.bf16.mxu1 %v755_v12  ;;  %v749_v17 = vld [vmem:[%s1019_s1 + $0x38] sm:$0xff]   ;;  %v750_v18 = vld [vmem:[%s1020_s0] ss:$12 sps:$4 sm:$0xff]  }
   0x7   :  { %627 = vmatpush3.bf16.msra.mxu0 %v737_v3  ;;  %727 = vmatpush3.bf16.msra.mxu1 %v737_v3  ;;  %v747_v15 = vld [vmem:[%s1019_s1 + $0x30] sm:$0xff]   ;;  %v756_v19 = vld [vmem:[%s1019_s1 + $0x80] sm:$0xff]   ;;  %v757_v21 = vld [vmem:[%s1020_s0 + $0x1c] ss:$12 sps:$4 sm:$0xff]  }
   0x8   :  { %628 = vmatprep.subr.bf16.mxu0 %v738_v4  ;;  %720 = vmatprep.subr.bf16.mxu1 %v738_v4  ;;  %v753_v20 = vld [vmem:[%s1020_s0 + $0x90] ss:$12 sps:$4 sm:$0xff]   ;;  %v759_v22 = vld [vmem:[%s1020_s0 + $0xac] ss:$12 sps:$4 sm:$0xff]   ;;  %v762_v25 = vld [vmem:[%s1020_s0 + $0xa8] ss:$12 sps:$4 sm:$0xff]  }
   0x9   :  { %v763_v23 = vld [vmem:[%s1019_s1 + $0x88] sm:$0xff]   ;;  %v761_v24 = vld [vmem:[%s1020_s0 + $0x18] ss:$12 sps:$4 sm:$0xff]   ;;  %v764_v26 = vld [vmem:[%s1020_s0 + $0x34] ss:$12 sps:$4 sm:$0xff]  }
   0xa   :  { %v766_v27 = vld [vmem:[%s1020_s0 + $0x8] ss:$12 sps:$4 sm:$0xff]   ;;  %v767_v28 = vld [vmem:[%s1020_s0 + $0x30] ss:$12 sps:$4 sm:$0xff]   ;;  %v768_v29 = vld [vmem:[%s1020_s0 + $0x20] ss:$12 sps:$4 sm:$0xff]  }
   0xb   :  { %629 = vmatpush3.bf16.msra.mxu0 %v739_v5  ;;  %728 = vmatpush3.bf16.msra.mxu1 %v739_v5  ;;  %v769_v30 = vld [vmem:[%s1020_s0 + $0x4c] ss:$12 sps:$4 sm:$0xff]   ;;  %v772_v32 = vld [vmem:[%s1020_s0 + $0x48] ss:$12 sps:$4 sm:$0xff]   ;;  %v773_v33 = vld [vmem:[%s1020_s0 + $0x50] ss:$12 sps:$4 sm:$0xff]  }
   0xc   :  { %630 = vmatprep.subr.bf16.mxu0 %v740_v6  ;;  %721 = vmatprep.subr.bf16.mxu1 %v740_v6  ;;  %v771_v31 = vld [vmem:[%s1020_s0 + $0x38] ss:$12 sps:$4 sm:$0xff]   ;;  %v776_v35 = vld [vmem:[%s1020_s0 + $0x68] ss:$12 sps:$4 sm:$0xff]   ;;  %v777_v36 = vld [vmem:[%s1020_s0 + $0x60] ss:$12 sps:$4 sm:$0xff]  }
   0xd   :  { %v774_v34 = vld [vmem:[%s1020_s0 + $0x64] ss:$12 sps:$4 sm:$0xff]   ;;  %v778_v37 = vld [vmem:[%s1020_s0 + $0x80] ss:$12 sps:$4 sm:$0xff]   ;;  %v779_v38 = vld [vmem:[%s1020_s0 + $0x7c] ss:$12 sps:$4 sm:$0xff]  }
   0xe   :  { %v781_v39 = vld [vmem:[%s1020_s0 + $0x98] ss:$12 sps:$4 sm:$0xff]   ;;  %v783_v41 = vld [vmem:[%s1020_s0 + $0xb0] ss:$12 sps:$4 sm:$0xff]   ;;  %v949_v2 = vld [vmem:[%s1021_s2] ss:$0 sm:$0xff] }
   0xf   :  { %631 = vmatpush3.bf16.msra.mxu0 %v741_v7  ;;  %729 = vmatpush3.bf16.msra.mxu1 %v741_v7  ;;  %v782_v40 = vld [vmem:[%s1020_s0 + $0x78] ss:$12 sps:$4 sm:$0xff]  }
  0x10   :  { %632 = vmatprep.subr.bf16.mxu0 %v742_v8  ;;  %722 = vmatprep.subr.bf16.mxu1 %v742_v8 }
  0x13   :  { %633 = vmatpush3.bf16.msra.mxu0 %v743_v9  ;;  %730 = vmatpush3.bf16.msra.mxu1 %v743_v9 }
  0x14   :  { %634 = vmatprep.subr.bf16.mxu0 %v744_v10  ;;  %723 = vmatprep.subr.bf16.mxu1 %v744_v10 }
  0x17   :  { %635 = vmatpush3.bf16.msra.mxu0 %v745_v13  ;;  %731 = vmatpush3.bf16.msra.mxu1 %v745_v13 }
  0x18   :  { %636 = vmatprep.subr.bf16.mxu0 %v746_v14  ;;  %724 = vmatprep.subr.bf16.mxu1 %v746_v14 }
  0x1b   :  { %637 = vmatpush3.bf16.msra.mxu0 %v747_v15  ;;  %732 = vmatpush3.bf16.msra.mxu1 %v747_v15 }
  0x1c   :  { %638 = vmatprep.subr.bf16.mxu0 %v748_v16  ;;  %725 = vmatprep.subr.bf16.mxu1 %v748_v16 }
  0x1f   :  { %639 = vmatpush3.bf16.msra.mxu0 %v749_v17  ;;  %733 = vmatpush3.bf16.msra.mxu1 %v749_v17 }
  0x20   :  { %698 = vmatprep.subr.bf16.mxu1 %v756_v19 }
  0x22   :  { %376 = vmatmul.mubr.bf16.vlgmr.msra.gmra.mrb[0].mxu0 %v750_v18  ;;  %424 = vmatmul.mubr.bf16.vlgmr.msra.gmra.mrb[0].mxu1 %v753_v20 }
  0x23   :  { %699 = vmatpush3.bf16.msra.mxu1 %v756_v19  ;;  %383 = vmatprep.mubr.bf16.mxu0 %v757_v21 }
  0x24   :  { %431 = vmatprep.mubr.bf16.mxu1 %v759_v22  ;;  %700 = vmatprep.subr.bf16.mxu1 %v763_v23 }
  0x27   :  { %701 = vmatpush3.bf16.msra.mxu1 %v763_v23 }
  0x2a   :  { %384 = vmatmul.mubr.bf16.gmra.mrb[4].mxu0 %v761_v24  ;;  %432 = vmatmul.mubr.bf16.gmra.mrb[4].mxu1 %v762_v25 }
  0x2b   :  { %391 = vmatprep.mubr.bf16.mxu0 %v764_v26  ;;  %702 = vmatprep.mubr.msk.bf16.mxu1 %vm318_vm0, %v766_v27 }
  0x32   :  { %392 = vmatmul.mubr.bf16.gmra.mrb[8].mxu0 %v767_v28  ;;  %703 = vmatmul.mubr.msk.bf16.vlgmr.msra.gmra.mrb[8].mxu1 %vm318_vm0, %v768_v29 }
  0x33   :  { %399 = vmatprep.mubr.bf16.mxu0 %v769_v30  ;;  %706 = vmatprep.mubr.msk.bf16.mxu1 %vm318_vm0, %v771_v31 }
  0x3a   :  { %400 = vmatmul.mubr.bf16.gmra.mrb[12].mxu0 %v772_v32  ;;  %707 = vmatmul.mubr.msk.bf16.gmra.mrb[12].mxu1 %vm318_vm0, %v773_v33 }
  0x3b   :  { %407 = vmatprep.mubr.bf16.mxu0 %v774_v34  ;;  %710 = vmatprep.mubr.msk.bf16.mxu1 %vm318_vm0, %v776_v35 }
  0x42   :  { %408 = vmatmul.mubr.bf16.gmra.mrb[16].mxu0 %v777_v36  ;;  %711 = vmatmul.mubr.msk.bf16.gmra.mrb[16].mxu1 %vm318_vm0, %v778_v37 }
  0x43   :  { %415 = vmatprep.mubr.bf16.mxu0 %v779_v38  ;;  %714 = vmatprep.mubr.msk.bf16.mxu1 %vm318_vm0, %v781_v39 }
  0x4a   :  { %416 = vmatmul.mubr.bf16.gmra.mrb[20].mxu0 %v782_v40  ;;  %715 = vmatmul.mubr.msk.bf16.gmra.mrb[20].mxu1 %vm318_vm0, %v783_v41 }
  0xf5   :  { %v640_v42 = vpop.f32.mrb[0].mxu0  ;;  %v676_v43 = vpop.f32.mrb[0].mxu1 }
  0xf6   :  { %v641_v44 = vpop.f32.mrb[1].mxu0  ;;  %v677_v45 = vpop.f32.mrb[1].mxu1 }
  0xf7   :  { %v642_v46 = vadd.f32 %v641_v44, %v640_v42  ;;  %v643_v47 = vpop.f32.mrb[2].mxu0  ;;  %v938_v48 = vadd.f32 %v677_v45, %v676_v43  ;;  %v679_v49 = vpop.f32.mrb[2].mxu1 }
  0xf8   :  { %v644_v50 = vpop.f32.mrb[3].mxu0  ;;  %v680_v51 = vpop.f32.mrb[3].mxu1 }
  0xf9   :  { %v645_v52 = vadd.f32 %v644_v50, %v643_v47  ;;  %v940_v53 = vadd.f32 %v680_v51, %v679_v49  ;;  %v378_v6 = vadd.f32 %v642_v46, %v949_v2 }
  0xfb   :  { %v381_v15 = vadd.f32 %v645_v52, %v949_v2 }
  0xfd   :  { %v646_v54 = vpop.f32.mrb[4].mxu0  ;;  %v682_v55 = vpop.f32.mrb[4].mxu1 }
  0xfe   :  { %v647_v56 = vpop.f32.mrb[5].mxu0  ;;  %v683_v57 = vpop.f32.mrb[5].mxu1 }
  0xff   :  { %v648_v58 = vadd.f32 %v647_v56, %v646_v54  ;;  %v649_v59 = vpop.f32.mrb[6].mxu0  ;;  %v942_v60 = vadd.f32 %v683_v57, %v682_v55  ;;  %v685_v61 = vpop.f32.mrb[6].mxu1 }
 0x100   :  { %v650_v62 = vpop.f32.mrb[7].mxu0  ;;  %v686_v63 = vpop.f32.mrb[7].mxu1 }
 0x101   :  { %v651_v0 = vadd.f32 %v650_v62, %v649_v59  ;;  %v944_v1 = vadd.f32 %v686_v63, %v685_v61  ;;  %v386_v3 = vadd.f32 %v648_v58, %v949_v2  ;;  %v434_v63 = vadd.f32 %v942_v60, %v949_v2 }
 0x103   :  { %v389_v10 = vadd.f32 %v651_v0, %v949_v2 }
 0x105   :  { %v652_v4 = vpop.f32.mrb[8].mxu0  ;;  %v704_v5 = vpop.f32.mrb[8].mxu1 }
 0x106   :  { %v483_v7 = vadd.f32 %v704_v5, %v386_v3  ;;  %v653_v8 = vpop.f32.mrb[9].mxu0  ;;  %v474_v9 = vpop.f32.mrb[9].mxu1 }
 0x107   :  { %v654_v11 = vadd.f32 %v653_v8, %v652_v4  ;;  %v475_v12 = vadd.f32 %v474_v9, %v378_v6  ;;  %v655_v13 = vpop.f32.mrb[10].mxu0  ;;  %v705_v14 = vpop.f32.mrb[10].mxu1  ;;  %v426_v6 = vadd.f32 %v938_v48, %v949_v2 }
 0x108   :  { %v539_v16 = vmax.f32 %v483_v7, 0.0  ;;  %v486_v17 = vadd.f32 %v705_v14, %v389_v10  ;;  %v656_v18 = vpop.f32.mrb[11].mxu0  ;;  %v477_v19 = vpop.f32.mrb[11].mxu1  ;;  %v437_v10 = vadd.f32 %v944_v1, %v949_v2 }
 0x109   :  { %v537_v20 = vmax.f32 %v475_v12, 0.0  ;;  %v657_v21 = vadd.f32 %v656_v18, %v655_v13  ;;  %v478_v22 = vadd.f32 %v477_v19, %v381_v15  ;;  %v394_v27 = vadd.f32 %v654_v11, %v949_v2 }
 0x10a   :  { %555 = vst [vmem:[%s1022_s3 + $0x10] sm:$0xff] %v539_v16  ;;  %v540_v23 = vmax.f32 %v486_v17, 0.0  ;;  %v429_v15 = vadd.f32 %v940_v53, %v949_v2 }
 0x10b   :  { %553 = vst [vmem:[%s1022_s3] sm:$0xff] %v537_v20  ;;  %v538_v24 = vmax.f32 %v478_v22, 0.0  ;;  %v397_v34 = vadd.f32 %v657_v21, %v949_v2 }
 0x10c   :  { %556 = vst [vmem:[%s1022_s3 + $0x18] sm:$0xff] %v540_v23 }
 0x10d   :  { %554 = vst [vmem:[%s1022_s3 + $0x8] sm:$0xff] %v538_v24  ;;  %v658_v25 = vpop.f32.mrb[12].mxu0  ;;  %v708_v26 = vpop.f32.mrb[12].mxu1 }
 0x10e   :  { %v659_v28 = vpop.f32.mrb[13].mxu0  ;;  %v490_v29 = vpop.f32.mrb[13].mxu1 }
 0x10f   :  { %v660_v30 = vadd.f32 %v659_v28, %v658_v25  ;;  %v491_v31 = vadd.f32 %v490_v29, %v394_v27  ;;  %v661_v32 = vpop.f32.mrb[14].mxu0  ;;  %v709_v33 = vpop.f32.mrb[14].mxu1 }
 0x110   :  { %v662_v35 = vpop.f32.mrb[15].mxu0  ;;  %v493_v36 = vpop.f32.mrb[15].mxu1 }
 0x111   :  { %v402_v37 = vadd.f32 %v660_v30, %v949_v2  ;;  %v541_v38 = vmax.f32 %v491_v31, 0.0  ;;  %v663_v39 = vadd.f32 %v662_v35, %v661_v32  ;;  %v494_v40 = vadd.f32 %v493_v36, %v397_v34 }
 0x113   :  { %v499_v41 = vadd.f32 %v708_v26, %v402_v37  ;;  %557 = vst [vmem:[%s1022_s3 + $0x20] sm:$0xff] %v541_v38  ;;  %v405_v42 = vadd.f32 %v663_v39, %v949_v2  ;;  %v542_v43 = vmax.f32 %v494_v40, 0.0 }
 0x115   :  { %v543_v44 = vmax.f32 %v499_v41, 0.0  ;;  %v502_v45 = vadd.f32 %v709_v33, %v405_v42  ;;  %558 = vst [vmem:[%s1022_s3 + $0x28] sm:$0xff] %v542_v43  ;;  %v664_v46 = vpop.f32.mrb[16].mxu0  ;;  %v712_v47 = vpop.f32.mrb[16].mxu1 }
 0x116   :  { %v665_v49 = vpop.f32.mrb[17].mxu0  ;;  %v506_v50 = vpop.f32.mrb[17].mxu1 }
 0x117   :  { %559 = vst [vmem:[%s1022_s3 + $0x30] sm:$0xff] %v543_v44  ;;  %v544_v51 = vmax.f32 %v502_v45, 0.0  ;;  %v666_v52 = vadd.f32 %v665_v49, %v664_v46  ;;  %v667_v54 = vpop.f32.mrb[18].mxu0  ;;  %v713_v55 = vpop.f32.mrb[18].mxu1 }
 0x118   :  { %v668_v56 = vpop.f32.mrb[19].mxu0  ;;  %v509_v57 = vpop.f32.mrb[19].mxu1 }
 0x119   :  { %560 = vst [vmem:[%s1022_s3 + $0x38] sm:$0xff] %v544_v51  ;;  %v410_v58 = vadd.f32 %v666_v52, %v949_v2  ;;  %v669_v59 = vadd.f32 %v668_v56, %v667_v54 }
 0x11b   :  { %v507_v61 = vadd.f32 %v506_v50, %v410_v58  ;;  %v413_v62 = vadd.f32 %v669_v59, %v949_v2 }
 0x11d   :  { %v545_v0 = vmax.f32 %v507_v61, 0.0  ;;  %v510_v3 = vadd.f32 %v509_v57, %v413_v62  ;;  %v670_v4 = vpop.f32.mrb[20].mxu0  ;;  %v716_v5 = vpop.f32.mrb[20].mxu1 }
 0x11e   :  { %v531_v7 = vadd.f32 %v716_v5, %v434_v63  ;;  %v671_v8 = vpop.f32.mrb[21].mxu0  ;;  %v522_v9 = vpop.f32.mrb[21].mxu1 }
 0x11f   :  { %561 = vst [vmem:[%s1022_s3 + $0x40] sm:$0xff] %v545_v0  ;;  %v546_v11 = vmax.f32 %v510_v3, 0.0  ;;  %v672_v12 = vadd.f32 %v671_v8, %v670_v4  ;;  %v523_v60 = vadd.f32 %v522_v9, %v426_v6  ;;  %v673_v13 = vpop.f32.mrb[22].mxu0  ;;  %v717_v14 = vpop.f32.mrb[22].mxu1 }
 0x120   :  { %v551_v16 = vmax.f32 %v531_v7, 0.0  ;;  %v534_v48 = vadd.f32 %v717_v14, %v437_v10  ;;  %v674_v17 = vpop.f32.mrb[23].mxu0  ;;  %v525_v18 = vpop.f32.mrb[23].mxu1 }
 0x121   :  { %562 = vst [vmem:[%s1022_s3 + $0x48] sm:$0xff] %v546_v11  ;;  %v418_v1 = vadd.f32 %v672_v12, %v949_v2  ;;  %v549_v19 = vmax.f32 %v523_v60, 0.0  ;;  %v675_v20 = vadd.f32 %v674_v17, %v673_v13  ;;  %v526_v21 = vadd.f32 %v525_v18, %v429_v15 }
 0x122   :  { %567 = vst [vmem:[%s1022_s3 + $0x70] sm:$0xff] %v551_v16  ;;  %v552_v22 = vmax.f32 %v534_v48, 0.0 }
 0x123   :  { %v515_v23 = vadd.f32 %v712_v47, %v418_v1  ;;  %565 = vst [vmem:[%s1022_s3 + $0x60] sm:$0xff] %v549_v19  ;;  %v421_v53 = vadd.f32 %v675_v20, %v949_v2  ;;  %v550_v24 = vmax.f32 %v526_v21, 0.0 }
 0x124   :  { %568 = vst [vmem:[%s1022_s3 + $0x78] sm:$0xff] %v552_v22 }
 0x125   :  { %v547_v25 = vmax.f32 %v515_v23, 0.0  ;;  %v518_v26 = vadd.f32 %v713_v55, %v421_v53  ;;  %566 = vst [vmem:[%s1022_s3 + $0x68] sm:$0xff] %v550_v24 }
 0x127   :  { %563 = vst [vmem:[%s1022_s3 + $0x50] sm:$0xff] %v547_v25  ;;  %v548_v27 = vmax.f32 %v518_v26, 0.0 }
 0x129   :  { %564 = vst [vmem:[%s1022_s3 + $0x58] sm:$0xff] %v548_v27 }

// kernel: tile.13
= control target key start
LH: loop header
LB: loop body
LE: loop exit
PB: predicated region body
PF: predicated region fallthrough
CT: control target
= control target key end

     0   :  { %s22_s0 = inlined_call_operand.vmem [shape: f32[64], index: 0, kind: input, shape index: {}]   ;;  %s23_s1 = inlined_call_operand.vmem [shape: f32[4,64], index: 1, kind: output, shape index: {}]  }
   0x1   :  { %v4_v0 = vld [vmem:[%s22_s0] ss:$0 sm:$0xff] }
   0x2   :  { %5 = vst [vmem:[%s23_s1] sm:$0xf] %v4_v0 }

// kernel: tile.14
= control target key start
LH: loop header
LB: loop body
LE: loop exit
PB: predicated region body
PF: predicated region fallthrough
CT: control target
= control target key end

     0   :  { %s6_s8 = smov 3  ;;  %vm8_vm0 = vcmask 523264   ;;  %s30_s9 = smov 64   ;;  %vm15_vm1 = vcmask 1048064   ;;  %s50_s0 = inlined_call_operand.vmem [shape: f32[4,64], index: 0, kind: input, shape index: {}]   ;;  %s51_s1 = inlined_call_operand.vmem [shape: f32[1,256], index: 1, kind: output, shape index: {}]  }
   0x1   :  { %v4_v0 = vld [vmem:[%s50_s0] sm:$0xf]  ;;  %s11_s0 = smov 3 }
   0x2   :  { %5 = vst [vmem:[#allocation1] sm:$0xf] %v4_v0 }
   0x9   :  { %v12_v1 = vld [vmem:[#allocation1 + $0x1] ss:$2 sm:%s11_s0]   ;;  %v7_v2 = vld [vmem:[#allocation1] ss:$2 sm:%s6_s8]  }
   0xa   :  { %13 = vrot.lane.b32.xlu0 %v12_v1, %s30_s9  ;;  %9 = vst.msk [vmem:[#allocation0] ss:$8 sm:$0x3] %vm8_vm0, %v7_v2  }
  0x7c   :  { %v14_v3 = vpop.permute.xlu0 %13  }
  0x7d   :  { %16 = vst.msk [vmem:[#allocation0] ss:$8 sm:$0x3] %vm15_vm1, %v14_v3  }
  0x84   :  { %v20_v4 = vld [vmem:[#allocation0] sm:$0x1]  ;;  %v24_v5 = vld [vmem:[#allocation0 + $0x8] sm:$0x1] }
  0x85   :  { %22 = vst [vmem:[%s51_s1] sm:$0x1] %v20_v4  ;;  %28 = vst [vmem:[%s51_s1 + $0x1] sm:$0x1] %v24_v5 }

// kernel: autoencoder_forward.8
= control target key start
LH: loop header
LB: loop body
LE: loop exit
PB: predicated region body
PF: predicated region fallthrough
CT: control target
= control target key end

     0   :  { %vm372_vm0 = vcmask 523264   ;;  %s884_s1 = inlined_call_operand.vmem [shape: bf16[576,128], index: 1, kind: input, shape index: {}]   ;;  %s885_s0 = inlined_call_operand.vmem [shape: bf16[32,576], index: 0, kind: input, shape index: {}]   ;;  %s886_s2 = inlined_call_operand.vmem [shape: f32[1,128], index: 2, kind: input, shape index: {}]   ;;  %s887_s3 = inlined_call_operand.vmem [shape: f32[32,128], index: 3, kind: output, shape index: {}]  }
   0x1   :  { %v661_v0 = vld [vmem:[%s884_s1 + $0x40] sm:$0xff]   ;;  %v665_v4 = vld [vmem:[%s884_s1 + $0x48] sm:$0xff]   ;;  %v669_v8 = vld [vmem:[%s884_s1 + $0x50] sm:$0xff]  }
   0x2   :  { %v662_v1 = vld [vmem:[%s884_s1] sm:$0xff]   ;;  %587 = vmatprep.subr.bf16.mxu0 %v661_v0  ;;  %v666_v5 = vld [vmem:[%s884_s1 + $0x8] sm:$0xff]   ;;  %v670_v9 = vld [vmem:[%s884_s1 + $0x10] sm:$0xff]  }
   0x3   :  { %v663_v2 = vld [vmem:[%s884_s1 + $0xc0] sm:$0xff]   ;;  %588 = vmatpush3.bf16.msra.mxu0 %v662_v1  ;;  %v667_v6 = vld [vmem:[%s884_s1 + $0xc8] sm:$0xff]   ;;  %v671_v10 = vld [vmem:[%s884_s1 + $0xd0] sm:$0xff]  }
   0x4   :  { %v664_v3 = vld [vmem:[%s884_s1 + $0x80] sm:$0xff]   ;;  %615 = vmatprep.subr.bf16.mxu1 %v663_v2  ;;  %589 = vmatprep.subr.bf16.mxu0 %v665_v4  ;;  %v668_v7 = vld [vmem:[%s884_s1 + $0x88] sm:$0xff]   ;;  %v672_v11 = vld [vmem:[%s884_s1 + $0x90] sm:$0xff]  }
   0x5   :  { %616 = vmatpush3.bf16.msra.mxu1 %v664_v3  ;;  %v673_v12 = vld [vmem:[%s884_s1 + $0x58] sm:$0xff]   ;;  %v677_v16 = vld [vmem:[%s884_s1 + $0x60] sm:$0xff]   ;;  %v681_v20 = vld [vmem:[%s884_s1 + $0x68] sm:$0xff]  }
   0x6   :  { %617 = vmatprep.subr.bf16.mxu1 %v667_v6  ;;  %v674_v13 = vld [vmem:[%s884_s1 + $0x18] sm:$0xff]   ;;  %v678_v17 = vld [vmem:[%s884_s1 + $0x20] sm:$0xff]   ;;  %v682_v21 = vld [vmem:[%s884_s1 + $0x28] sm:$0xff]  }
   0x7   :  { %590 = vmatpush3.bf16.msra.mxu0 %v666_v5  ;;  %v675_v14 = vld [vmem:[%s884_s1 + $0xd8] sm:$0xff]   ;;  %v679_v18 = vld [vmem:[%s884_s1 + $0xe0] sm:$0xff]   ;;  %v683_v22 = vld [vmem:[%s884_s1 + $0xe8] sm:$0xff]  }
   0x8   :  { %591 = vmatprep.subr.bf16.mxu0 %v669_v8  ;;  %v676_v15 = vld [vmem:[%s884_s1 + $0x98] sm:$0xff]   ;;  %v680_v19 = vld [vmem:[%s884_s1 + $0xa0] sm:$0xff]   ;;  %v684_v23 = vld [vmem:[%s884_s1 + $0xa8] sm:$0xff]  }
   0x9   :  { %618 = vmatpush3.bf16.msra.mxu1 %v668_v7  ;;  %v685_v24 = vld [vmem:[%s884_s1 + $0x70] sm:$0xff]   ;;  %v689_v28 = vld [vmem:[%s884_s1 + $0x78] sm:$0xff]   ;;  %v696_v34 = vld [vmem:[%s884_s1 + $0x100] sm:$0xff]  }
   0xa   :  { %619 = vmatprep.subr.bf16.mxu1 %v671_v10  ;;  %v686_v25 = vld [vmem:[%s884_s1 + $0x30] sm:$0xff]   ;;  %v690_v29 = vld [vmem:[%s884_s1 + $0x38] sm:$0xff]   ;;  %v699_v36 = vld [vmem:[%s885_s0 + $0xc] ss:$20 sps:$4 sm:$0xff]  }
   0xb   :  { %592 = vmatpush3.bf16.msra.mxu0 %v670_v9  ;;  %v687_v26 = vld [vmem:[%s884_s1 + $0xf0] sm:$0xff]   ;;  %v691_v30 = vld [vmem:[%s884_s1 + $0xf8] sm:$0xff]   ;;  %v700_v37 = vld [vmem:[%s884_s1 + $0x108] sm:$0xff]   ;;  %460 = vmatprep.mubr.bf16.mxu1 %v699_v36 }
   0xc   :  { %593 = vmatprep.subr.bf16.mxu0 %v673_v12  ;;  %v688_v27 = vld [vmem:[%s884_s1 + $0xb0] sm:$0xff]   ;;  %v694_v32 = vld [vmem:[%s885_s0 + $0x4] ss:$20 sps:$4 sm:$0xff]   ;;  %v697_v35 = vld [vmem:[%s885_s0 + $0x8] ss:$20 sps:$4 sm:$0xff]  }
   0xd   :  { %620 = vmatpush3.bf16.msra.mxu1 %v672_v11  ;;  %v692_v31 = vld [vmem:[%s885_s0] ss:$20 sps:$4 sm:$0xff]   ;;  %v695_v33 = vld [vmem:[%s884_s1 + $0xb8] sm:$0xff]   ;;  %411 = vmatprep.mubr.bf16.mxu0 %v694_v32  ;;  %v707_v42 = vld [vmem:[%s885_s0 + $0x30] ss:$20 sps:$4 sm:$0xff]  }
   0xe   :  { %621 = vmatprep.subr.bf16.mxu1 %v675_v14  ;;  %v701_v38 = vld [vmem:[%s885_s0 + $0x2c] ss:$20 sps:$4 sm:$0xff]   ;;  %v703_v39 = vld [vmem:[%s885_s0 + $0x28] ss:$20 sps:$4 sm:$0xff]   ;;  %v704_v40 = vld [vmem:[%s884_s1 + $0x110] sm:$0xff]  }
   0xf   :  { %594 = vmatpush3.bf16.msra.mxu0 %v674_v13  ;;  %v705_v41 = vld [vmem:[%s885_s0 + $0x34] ss:$20 sps:$4 sm:$0xff]   ;;  %v708_v43 = vld [vmem:[%s884_s1 + $0x118] sm:$0xff]   ;;  %v709_v44 = vld [vmem:[%s885_s0 + $0x10] ss:$20 sps:$4 sm:$0xff]  }
  0x10   :  { %595 = vmatprep.subr.bf16.mxu0 %v677_v16  ;;  %v710_v45 = vld [vmem:[%s885_s0 + $0x38] ss:$20 sps:$4 sm:$0xff]   ;;  %v538_v47 = vld [vmem:[%s886_s2] ss:$0 sm:$0xff] }
  0x11   :  { %622 = vmatpush3.bf16.msra.mxu1 %v676_v15 }
  0x12   :  { %623 = vmatprep.subr.bf16.mxu1 %v679_v18 }
  0x13   :  { %596 = vmatpush3.bf16.msra.mxu0 %v678_v17 }
  0x14   :  { %597 = vmatprep.subr.bf16.mxu0 %v681_v20 }
  0x15   :  { %624 = vmatpush3.bf16.msra.mxu1 %v680_v19 }
  0x16   :  { %625 = vmatprep.subr.bf16.mxu1 %v683_v22 }
  0x17   :  { %598 = vmatpush3.bf16.msra.mxu0 %v682_v21 }
  0x18   :  { %599 = vmatprep.subr.bf16.mxu0 %v685_v24 }
  0x19   :  { %626 = vmatpush3.bf16.msra.mxu1 %v684_v23 }
  0x1a   :  { %627 = vmatprep.subr.bf16.mxu1 %v687_v26 }
  0x1b   :  { %600 = vmatpush3.bf16.msra.mxu0 %v686_v25 }
  0x1c   :  { %601 = vmatprep.subr.bf16.mxu0 %v689_v28 }
  0x1d   :  { %628 = vmatpush3.bf16.msra.mxu1 %v688_v27 }
  0x1e   :  { %629 = vmatprep.subr.bf16.mxu1 %v691_v30 }
  0x1f   :  { %602 = vmatpush3.bf16.msra.mxu0 %v690_v29 }
  0x20   :  { %649 = vmatprep.subr.bf16.mxu0 %v696_v34 }
  0x21   :  { %630 = vmatpush3.bf16.msra.mxu1 %v695_v33 }
  0x22   :  { %412 = vmatmul.mubr.bf16.vlgmr.msra.gmra.mrb[0].mxu0 %v692_v31 }
  0x23   :  { %650 = vmatpush3.bf16.msra.mxu0 %v696_v34  ;;  %419 = vmatprep.mubr.bf16.mxu0 %v701_v38 }
  0x24   :  { %461 = vmatmul.mubr.bf16.vlgmr.msra.gmra.mrb[0].mxu1 %v697_v35  ;;  %651 = vmatprep.subr.bf16.mxu0 %v700_v37 }
  0x25   :  { %468 = vmatprep.mubr.bf16.mxu1 %v705_v41 }
  0x27   :  { %652 = vmatpush3.bf16.msra.mxu0 %v700_v37 }
  0x28   :  { %653 = vmatprep.subr.bf16.mxu0 %v704_v40 }
  0x2a   :  { %420 = vmatmul.mubr.bf16.gmra.mrb[4].mxu0 %v703_v39 }
  0x2b   :  { %657 = vmatprep.mubr.msk.bf16.mxu0 %vm372_vm0, %v709_v44  ;;  %654 = vmatpush3.bf16.msra.mxu0 %v704_v40 }
  0x2c   :  { %469 = vmatmul.mubr.bf16.gmra.mrb[4].mxu1 %v707_v42  ;;  %655 = vmatprep.subr.bf16.mxu0 %v708_v43 }
  0x2f   :  { %656 = vmatpush3.bf16.msra.mxu0 %v708_v43 }
  0x32   :  { %658 = vmatmul.mubr.msk.bf16.vlgmr.msra.gmra.mrb[8].mxu0 %vm372_vm0, %v710_v45 }
  0xf5   :  { %v603_v46 = vpop.f32.mrb[0].mxu0 }
  0xf6   :  { %v604_v48 = vpop.f32.mrb[1].mxu0 }
  0xf7   :  { %v605_v49 = vadd.f32 %v604_v48, %v603_v46  ;;  %v606_v50 = vpop.f32.mrb[2].mxu0  ;;  %v631_v51 = vpop.f32.mrb[0].mxu1 }
  0xf8   :  { %v607_v52 = vpop.f32.mrb[3].mxu0  ;;  %v632_v55 = vpop.f32.mrb[1].mxu1 }
  0xf9   :  { %v414_v53 = vadd.f32 %v605_v49, %v538_v47  ;;  %v608_v54 = vadd.f32 %v607_v52, %v606_v50  ;;  %v633_v56 = vadd.f32 %v632_v55, %v631_v51  ;;  %v634_v57 = vpop.f32.mrb[2].mxu1 }
  0xfa   :  { %v635_v59 = vpop.f32.mrb[3].mxu1 }
  0xfb   :  { %v417_v58 = vadd.f32 %v608_v54, %v538_v47  ;;  %v636_v60 = vadd.f32 %v635_v59, %v634_v57  ;;  %v463_v61 = vadd.f32 %v633_v56, %v414_v53 }
  0xfd   :  { %v609_v62 = vpop.f32.mrb[4].mxu0  ;;  %v466_v0 = vadd.f32 %v636_v60, %v417_v58 }
  0xfe   :  { %v610_v63 = vpop.f32.mrb[5].mxu0 }
  0xff   :  { %v611_v1 = vadd.f32 %v610_v63, %v609_v62  ;;  %v612_v2 = vpop.f32.mrb[6].mxu0  ;;  %v637_v3 = vpop.f32.mrb[4].mxu1 }
 0x100   :  { %v613_v4 = vpop.f32.mrb[7].mxu0  ;;  %v638_v7 = vpop.f32.mrb[5].mxu1 }
 0x101   :  { %v422_v5 = vadd.f32 %v611_v1, %v538_v47  ;;  %v614_v6 = vadd.f32 %v613_v4, %v612_v2  ;;  %v639_v8 = vadd.f32 %v638_v7, %v637_v3  ;;  %v640_v9 = vpop.f32.mrb[6].mxu1 }
 0x102   :  { %v641_v11 = vpop.f32.mrb[7].mxu1 }
 0x103   :  { %v425_v10 = vadd.f32 %v614_v6, %v538_v47  ;;  %v642_v12 = vadd.f32 %v641_v11, %v640_v9  ;;  %v471_v13 = vadd.f32 %v639_v8, %v422_v5 }
 0x105   :  { %v659_v14 = vpop.f32.mrb[8].mxu0  ;;  %v474_v15 = vadd.f32 %v642_v12, %v425_v10 }
 0x106   :  { %v520_v16 = vadd.f32 %v659_v14, %v471_v13  ;;  %v511_v17 = vpop.f32.mrb[9].mxu0 }
 0x107   :  { %v512_v18 = vadd.f32 %v511_v17, %v463_v61  ;;  %v660_v19 = vpop.f32.mrb[10].mxu0 }
 0x108   :  { %v528_v20 = vmax.f32 %v520_v16, 0.0  ;;  %v523_v21 = vadd.f32 %v660_v19, %v474_v15  ;;  %v514_v22 = vpop.f32.mrb[11].mxu0 }
 0x109   :  { %v526_v23 = vmax.f32 %v512_v18, 0.0  ;;  %v515_v24 = vadd.f32 %v514_v22, %v466_v0 }
 0x10a   :  { %532 = vst [vmem:[%s887_s3 + $0x10] sm:$0xff] %v528_v20  ;;  %v529_v25 = vmax.f32 %v523_v21, 0.0 }
 0x10b   :  { %530 = vst [vmem:[%s887_s3] sm:$0xff] %v526_v23  ;;  %v527_v26 = vmax.f32 %v515_v24, 0.0 }
 0x10c   :  { %533 = vst [vmem:[%s887_s3 + $0x18] sm:$0xff] %v529_v25 }
 0x10d   :  { %531 = vst [vmem:[%s887_s3 + $0x8] sm:$0xff] %v527_v26 }

// kernel: autoencoder_forward.9
= control target key start
LH: loop header
LB: loop body
LE: loop exit
PB: predicated region body
PF: predicated region fallthrough
CT: control target
= control target key end

     0   :  { %s915_s1 = inlined_call_operand.vmem [shape: bf16[512,256], index: 1, kind: input, shape index: {}]   ;;  %s916_s0 = inlined_call_operand.vmem [shape: bf16[8,512], index: 0, kind: input, shape index: {}]   ;;  %s917_s2 = inlined_call_operand.vmem [shape: f32[1,256], index: 2, kind: input, shape index: {}]   ;;  %s918_s3 = inlined_call_operand.vmem [shape: f32[8,256], index: 3, kind: output, shape index: {}]  }
   0x1   :  { %v588_v0 = vld [vmem:[%s915_s1 + $0x4] ss:$8 sps:$4 sm:$0xff]   ;;  %v592_v2 = vld [vmem:[%s915_s1] ss:$8 sps:$4 sm:$0xff]   ;;  %v594_v4 = vld [vmem:[%s915_s1 + $0x14] ss:$8 sps:$4 sm:$0xff]  }
   0x2   :  { %v590_v1 = vld [vmem:[%s915_s1 + $0x104] ss:$8 sps:$4 sm:$0xff]   ;;  %426 = vmatprep.subr.bf16.mxu1 %v588_v0  ;;  %v593_v3 = vld [vmem:[%s915_s1 + $0x100] ss:$8 sps:$4 sm:$0xff]   ;;  %v596_v5 = vld [vmem:[%s915_s1 + $0x114] ss:$8 sps:$4 sm:$0xff]  }
   0x3   :  { %467 = vmatprep.subr.bf16.mxu0 %v590_v1  ;;  %427 = vmatpush1.bf16.msra.mxu1 %v592_v2  ;;  %v598_v6 = vld [vmem:[%s915_s1 + $0x10] ss:$8 sps:$4 sm:$0xff]   ;;  %v600_v8 = vld [vmem:[%s915_s1 + $0x24] ss:$8 sps:$4 sm:$0xff]   ;;  %v604_v10 = vld [vmem:[%s915_s1 + $0x20] ss:$8 sps:$4 sm:$0xff]  }
   0x4   :  { %468 = vmatpush1.bf16.msra.mxu0 %v593_v3  ;;  %428 = vmatprep.subr.bf16.mxu1 %v594_v4  ;;  %v599_v7 = vld [vmem:[%s915_s1 + $0x110] ss:$8 sps:$4 sm:$0xff]   ;;  %v602_v9 = vld [vmem:[%s915_s1 + $0x124] ss:$8 sps:$4 sm:$0xff]   ;;  %v605_v11 = vld [vmem:[%s915_s1 + $0x120] ss:$8 sps:$4 sm:$0xff]  }
   0x5   :  { %469 = vmatprep.subr.bf16.mxu0 %v596_v5  ;;  %v606_v12 = vld [vmem:[%s915_s1 + $0x34] ss:$8 sps:$4 sm:$0xff]   ;;  %v610_v14 = vld [vmem:[%s915_s1 + $0x30] ss:$8 sps:$4 sm:$0xff]   ;;  %v612_v16 = vld [vmem:[%s915_s1 + $0x44] ss:$8 sps:$4 sm:$0xff]  }
   0x6   :  { %v608_v13 = vld [vmem:[%s915_s1 + $0x134] ss:$8 sps:$4 sm:$0xff]   ;;  %v611_v15 = vld [vmem:[%s915_s1 + $0x130] ss:$8 sps:$4 sm:$0xff]   ;;  %v614_v17 = vld [vmem:[%s915_s1 + $0x144] ss:$8 sps:$4 sm:$0xff]  }
   0x7   :  { %429 = vmatpush1.bf16.msra.mxu1 %v598_v6  ;;  %v616_v18 = vld [vmem:[%s915_s1 + $0x40] ss:$8 sps:$4 sm:$0xff]   ;;  %v618_v20 = vld [vmem:[%s915_s1 + $0x54] ss:$8 sps:$4 sm:$0xff]   ;;  %v622_v22 = vld [vmem:[%s915_s1 + $0x50] ss:$8 sps:$4 sm:$0xff]   ;;  %v82_v6 = vlaneseq }
   0x8   :  { %470 = vmatpush1.bf16.msra.mxu0 %v599_v7  ;;  %430 = vmatprep.subr.bf16.mxu1 %v600_v8  ;;  %v617_v19 = vld [vmem:[%s915_s1 + $0x140] ss:$8 sps:$4 sm:$0xff]   ;;  %v620_v21 = vld [vmem:[%s915_s1 + $0x154] ss:$8 sps:$4 sm:$0xff]   ;;  %v623_v23 = vld [vmem:[%s915_s1 + $0x150] ss:$8 sps:$4 sm:$0xff]  }
   0x9   :  { %471 = vmatprep.subr.bf16.mxu0 %v602_v9  ;;  %v624_v24 = vld [vmem:[%s915_s1 + $0x64] ss:$8 sps:$4 sm:$0xff]   ;;  %v628_v26 = vld [vmem:[%s915_s1 + $0x60] ss:$8 sps:$4 sm:$0xff]   ;;  %v630_v28 = vld [vmem:[%s915_s1 + $0x74] ss:$8 sps:$4 sm:$0xff]  }
   0xa   :  { %v626_v25 = vld [vmem:[%s915_s1 + $0x164] ss:$8 sps:$4 sm:$0xff]   ;;  %v629_v27 = vld [vmem:[%s915_s1 + $0x160] ss:$8 sps:$4 sm:$0xff]   ;;  %v632_v29 = vld [vmem:[%s915_s1 + $0x174] ss:$8 sps:$4 sm:$0xff]  }
   0xb   :  { %431 = vmatpush1.bf16.msra.mxu1 %v604_v10  ;;  %v634_v30 = vld [vmem:[%s915_s1 + $0x70] ss:$8 sps:$4 sm:$0xff]   ;;  %v636_v32 = vld [vmem:[%s915_s1 + $0x84] ss:$8 sps:$4 sm:$0xff]   ;;  %v640_v34 = vld [vmem:[%s915_s1 + $0x80] ss:$8 sps:$4 sm:$0xff]  }
   0xc   :  { %472 = vmatpush1.bf16.msra.mxu0 %v605_v11  ;;  %432 = vmatprep.subr.bf16.mxu1 %v606_v12  ;;  %v635_v31 = vld [vmem:[%s915_s1 + $0x170] ss:$8 sps:$4 sm:$0xff]   ;;  %v638_v33 = vld [vmem:[%s915_s1 + $0x184] ss:$8 sps:$4 sm:$0xff]   ;;  %v641_v35 = vld [vmem:[%s915_s1 + $0x180] ss:$8 sps:$4 sm:$0xff]  }
   0xd   :  { %473 = vmatprep.subr.bf16.mxu0 %v608_v13  ;;  %v642_v36 = vld [vmem:[%s915_s1 + $0x94] ss:$8 sps:$4 sm:$0xff]   ;;  %v646_v38 = vld [vmem:[%s915_s1 + $0x90] ss:$8 sps:$4 sm:$0xff]   ;;  %v648_v40 = vld [vmem:[%s915_s1 + $0xa4] ss:$8 sps:$4 sm:$0xff]  }
   0xe   :  { %v644_v37 = vld [vmem:[%s915_s1 + $0x194] ss:$8 sps:$4 sm:$0xff]   ;;  %v647_v39 = vld [vmem:[%s915_s1 + $0x190] ss:$8 sps:$4 sm:$0xff]   ;;  %v650_v41 = vld [vmem:[%s915_s1 + $0x1a4] ss:$8 sps:$4 sm:$0xff]  }
   0xf   :  { %433 = vmatpush1.bf16.msra.mxu1 %v610_v14  ;;  %v652_v42 = vld [vmem:[%s915_s1 + $0xa0] ss:$8 sps:$4 sm:$0xff]   ;;  %v654_v44 = vld [vmem:[%s915_s1 + $0xb4] ss:$8 sps:$4 sm:$0xff]   ;;  %v658_v49 = vld [vmem:[%s915_s1 + $0xb0] ss:$8 sps:$4 sm:$0xff]  }
  0x10   :  { %474 = vmatpush1.bf16.msra.mxu0 %v611_v15  ;;  %434 = vmatprep.subr.bf16.mxu1 %v612_v16  ;;  %v653_v43 = vld [vmem:[%s915_s1 + $0x1a0] ss:$8 sps:$4 sm:$0xff]   ;;  %v656_v45 = vld [vmem:[%s915_s1 + $0x1b4] ss:$8 sps:$4 sm:$0xff]   ;;  %v659_v50 = vld [vmem:[%s915_s1 + $0x1b0] ss:$8 sps:$4 sm:$0xff]  }
  0x11   :  { %475 = vmatprep.subr.bf16.mxu0 %v614_v17  ;;  %v14_v46 = vld [vmem:[%s916_s0] sm:$0xff]  ;;  %v15_v48 = vld [vmem:[%s916_s0 + $0x8] sm:$0xff]  ;;  %v666_v56 = vld [vmem:[%s915_s1 + $0xd4] ss:$8 sps:$4 sm:$0xff]   ;;  %v83_v7 = vshrl.u32 %v82_v6, 7 }
  0x12   :  { %v517_v47 = vcombine.high %v14_v46, %v14_v46  ;;  %v519_v51 = vcombine.high %v15_v48, %v15_v48  ;;  %v660_v52 = vld [vmem:[%s915_s1 + $0xc4] ss:$8 sps:$4 sm:$0xff]   ;;  %v664_v54 = vld [vmem:[%s915_s1 + $0xc0] ss:$8 sps:$4 sm:$0xff]   ;;  %v668_v57 = vld [vmem:[%s915_s1 + $0x1d4] ss:$8 sps:$4 sm:$0xff]   ;;  %v516_v4 = vcombine.low %v14_v46, %v14_v46  ;;  %v518_v5 = vcombine.low %v15_v48, %v15_v48 }
  0x13   :  { %435 = vmatpush1.bf16.msra.mxu1 %v616_v18  ;;  %v662_v53 = vld [vmem:[%s915_s1 + $0x1c4] ss:$8 sps:$4 sm:$0xff]   ;;  %v665_v55 = vld [vmem:[%s915_s1 + $0x1c0] ss:$8 sps:$4 sm:$0xff]   ;;  %v670_v58 = vld [vmem:[%s915_s1 + $0xd0] ss:$8 sps:$4 sm:$0xff]  }
  0x14   :  { %476 = vmatpush1.bf16.msra.mxu0 %v617_v19  ;;  %436 = vmatprep.subr.bf16.mxu1 %v618_v20  ;;  %v671_v59 = vld [vmem:[%s915_s1 + $0x1d0] ss:$8 sps:$4 sm:$0xff]   ;;  %v672_v60 = vld [vmem:[%s915_s1 + $0xe4] ss:$8 sps:$4 sm:$0xff]   ;;  %v676_v62 = vld [vmem:[%s915_s1 + $0xe0] ss:$8 sps:$4 sm:$0xff]  }
  0x15   :  { %477 = vmatprep.subr.bf16.mxu0 %v620_v21  ;;  %458 = vmatprep.mubr.bf16.mxu1 %v517_v47  ;;  %v674_v61 = vld [vmem:[%s915_s1 + $0x1e4] ss:$8 sps:$4 sm:$0xff]   ;;  %v677_v63 = vld [vmem:[%s915_s1 + $0x1e0] ss:$8 sps:$4 sm:$0xff]   ;;  %v678_v0 = vld [vmem:[%s915_s1 + $0xf4] ss:$8 sps:$4 sm:$0xff]  }
  0x16   :  { %499 = vmatprep.mubr.bf16.mxu0 %v519_v51  ;;  %v680_v1 = vld [vmem:[%s915_s1 + $0x1f4] ss:$8 sps:$4 sm:$0xff]   ;;  %v682_v2 = vld [vmem:[%s915_s1 + $0xf0] ss:$8 sps:$4 sm:$0xff]   ;;  %v84_v8 = vsub.s32 0, %v83_v7  ;;  %v88_v10 = vsub.s32 1, %v83_v7 }
  0x17   :  { %437 = vmatpush1.bf16.msra.mxu1 %v622_v22  ;;  %v683_v3 = vld [vmem:[%s915_s1 + $0x1f0] ss:$8 sps:$4 sm:$0xff]   ;;  %v80_v9 = vld [vmem:[%s917_s2] sm:$0x3] }
  0x18   :  { %478 = vmatpush1.bf16.msra.mxu0 %v623_v23  ;;  %438 = vmatprep.subr.bf16.mxu1 %v624_v24  ;;  %v85_v11 = vrot.slane %v80_v9, %v84_v8  ;;  %v89_v12 = vrot.slane %v80_v9, %v88_v10 }
  0x19   :  { %479 = vmatprep.subr.bf16.mxu0 %v626_v25 }
  0x1b   :  { %439 = vmatpush1.bf16.msra.mxu1 %v628_v26 }
  0x1c   :  { %480 = vmatpush1.bf16.msra.mxu0 %v629_v27  ;;  %440 = vmatprep.subr.bf16.mxu1 %v630_v28 }
  0x1d   :  { %481 = vmatprep.subr.bf16.mxu0 %v632_v29 }
  0x1f   :  { %441 = vmatpush1.bf16.msra.mxu1 %v634_v30 }
  0x20   :  { %482 = vmatpush1.bf16.msra.mxu0 %v635_v31  ;;  %442 = vmatprep.subr.bf16.mxu1 %v636_v32 }
  0x21   :  { %483 = vmatprep.subr.bf16.mxu0 %v638_v33 }
  0x23   :  { %443 = vmatpush1.bf16.msra.mxu1 %v640_v34 }
  0x24   :  { %484 = vmatpush1.bf16.msra.mxu0 %v641_v35  ;;  %444 = vmatprep.subr.bf16.mxu1 %v642_v36 }
  0x25   :  { %485 = vmatprep.subr.bf16.mxu0 %v644_v37 }
  0x27   :  { %445 = vmatpush1.bf16.msra.mxu1 %v646_v38 }
  0x28   :  { %486 = vmatpush1.bf16.msra.mxu0 %v647_v39  ;;  %446 = vmatprep.subr.bf16.mxu1 %v648_v40 }
  0x29   :  { %487 = vmatprep.subr.bf16.mxu0 %v650_v41 }
  0x2b   :  { %447 = vmatpush1.bf16.msra.mxu1 %v652_v42 }
  0x2c   :  { %488 = vmatpush1.bf16.msra.mxu0 %v653_v43  ;;  %448 = vmatprep.subr.bf16.mxu1 %v654_v44 }
  0x2d   :  { %489 = vmatprep.subr.bf16.mxu0 %v656_v45 }
  0x2f   :  { %449 = vmatpush1.bf16.msra.mxu1 %v658_v49 }
  0x30   :  { %490 = vmatpush1.bf16.msra.mxu0 %v659_v50  ;;  %450 = vmatprep.subr.bf16.mxu1 %v660_v52 }
  0x31   :  { %491 = vmatprep.subr.bf16.mxu0 %v662_v53 }
  0x33   :  { %451 = vmatpush1.bf16.msra.mxu1 %v664_v54 }
  0x34   :  { %492 = vmatpush1.bf16.msra.mxu0 %v665_v55  ;;  %452 = vmatprep.subr.bf16.mxu1 %v666_v56 }
  0x35   :  { %493 = vmatprep.subr.bf16.mxu0 %v668_v57 }
  0x37   :  { %453 = vmatpush1.bf16.msra.mxu1 %v670_v58 }
  0x38   :  { %494 = vmatpush1.bf16.msra.mxu0 %v671_v59  ;;  %454 = vmatprep.subr.bf16.mxu1 %v672_v60 }
  0x39   :  { %495 = vmatprep.subr.bf16.mxu0 %v674_v61 }
  0x3b   :  { %455 = vmatpush1.bf16.msra.mxu1 %v676_v62 }
  0x3c   :  { %496 = vmatpush1.bf16.msra.mxu0 %v677_v63  ;;  %456 = vmatprep.subr.bf16.mxu1 %v678_v0 }
  0x3d   :  { %497 = vmatprep.subr.bf16.mxu0 %v680_v1 }
  0x3f   :  { %457 = vmatpush1.bf16.msra.mxu1 %v682_v2 }
  0x40   :  { %498 = vmatpush1.bf16.msra.mxu0 %v683_v3 }
  0x42   :  { %459 = vmatmul.mubr.bf16.vlgmr.msra.gmra.mrb[0].mxu1 %v516_v4 }
  0x43   :  { %500 = vmatmul.mubr.bf16.vlgmr.msra.gmra.mrb[0].mxu0 %v518_v5 }
 0x115   :  { %v460_v13 = vpop.f32.mrb[0].mxu1 }
 0x116   :  { %v501_v14 = vpop.f32.mrb[0].mxu0  ;;  %v461_v15 = vadd.f32 %v460_v13, %v85_v11  ;;  %v462_v16 = vpop.f32.mrb[1].mxu1 }
 0x117   :  { %v503_v17 = vpop.f32.mrb[1].mxu0  ;;  %v463_v18 = vadd.f32 %v462_v16, %v89_v12  ;;  %v464_v19 = vpop.f32.mrb[2].mxu1 }
 0x118   :  { %v505_v20 = vpop.f32.mrb[2].mxu0  ;;  %v502_v21 = vadd.f32 %v501_v14, %v461_v15  ;;  %v465_v22 = vpop.f32.mrb[3].mxu1 }
 0x119   :  { %v506_v23 = vpop.f32.mrb[3].mxu0  ;;  %v504_v24 = vadd.f32 %v503_v17, %v463_v18 }
 0x11a   :  { %v508_v25 = vmax.f32 %v502_v21, 0.0 }
 0x11b   :  { %v509_v26 = vmax.f32 %v504_v24, 0.0 }
 0x11c   :  { %510 = vst [vmem:[%s918_s3] sm:$0xff] %v508_v25 }
 0x11d   :  { %511 = vst [vmem:[%s918_s3 + $0x8] sm:$0xff] %v509_v26 }

// kernel: tile.18
= control target key start
LH: loop header
LB: loop body
LE: loop exit
PB: predicated region body
PF: predicated region fallthrough
CT: control target
= control target key end

     0   :  { %s22_s0 = inlined_call_operand.vmem [shape: f32[32], index: 0, kind: input, shape index: {}]   ;;  %s23_s1 = inlined_call_operand.vmem [shape: f32[4,32], index: 1, kind: output, shape index: {}]  }
   0x1   :  { %v4_v0 = vld [vmem:[%s22_s0] ss:$0 sm:$0xff] }
   0x2   :  { %5 = vst [vmem:[%s23_s1] sm:$0xf] %v4_v0 }

// kernel: tile.19
= control target key start
LH: loop header
LB: loop body
LE: loop exit
PB: predicated region body
PF: predicated region fallthrough
CT: control target
= control target key end

     0   :  { %vm7_vm0 = vcmask 261120   ;;  %s37_s8 = smov 32   ;;  %s38_s9 = smov 64   ;;  %vm13_vm1 = vcmask 1048320   ;;  %vm19_vm2 = vcmask 785920   ;;  %vm25_vm3 = vcmask 523520   ;;  %s55_s0 = inlined_call_operand.vmem [shape: f32[4,32], index: 0, kind: input, shape index: {}]   ;;  %s56_s1 = inlined_call_operand.vmem [shape: f32[1,128], index: 1, kind: output, shape index: {}]  }
   0x1   :  { %v4_v0 = vld [vmem:[%s55_s0] sm:$0xf]  ;;  %s36_s0 = smov 96  }
   0x2   :  { %5 = vst [vmem:[#allocation1] sm:$0xf] %v4_v0 }
   0x9   :  { %v10_v1 = vld [vmem:[#allocation1 + $0x3] sm:$0x1]   ;;  %v22_v2 = vld [vmem:[#allocation1 + $0x1] sm:$0x1]   ;;  %v6_v3 = vld [vmem:[#allocation1] sm:$0x1]  }
   0xa   :  { %11 = vrot.lane.b32.xlu0 %v10_v1, %s36_s0  ;;  %23 = vrot.lane.b32.xlu1 %v22_v2, %s37_s8  ;;  %v16_v4 = vld [vmem:[#allocation1 + $0x2] sm:$0x1]   ;;  %8 = vst.msk [vmem:[#allocation0] sm:$0x1] %vm7_vm0, %v6_v3  }
   0xe   :  { %17 = vrot.lane.b32.xlu0 %v16_v4, %s38_s9 }
  0x7c   :  { %v12_v5 = vpop.permute.xlu0 %11   ;;  %v24_v6 = vpop.permute.xlu1 %23  }
  0x7d   :  { %14 = vst.msk [vmem:[#allocation0] sm:$0x1] %vm13_vm1, %v12_v5  }
  0x80   :  { %v18_v7 = vpop.permute.xlu0 %17  }
  0x81   :  { %20 = vst.msk [vmem:[#allocation0] sm:$0x1] %vm19_vm2, %v18_v7  }
  0x82   :  { %26 = vst.msk [vmem:[#allocation0] sm:$0x1] %vm25_vm3, %v24_v6  }
  0x89   :  { %v30_v8 = vld [vmem:[#allocation0] sm:$0x1] }
  0x8a   :  { %32 = vst [vmem:[%s56_s1] sm:$0x1] %v30_v8 }

// kernel: autoencoder_forward.10
= control target key start
LH: loop header
LB: loop body
LE: loop exit
PB: predicated region body
PF: predicated region fallthrough
CT: control target
= control target key end

     0   :  { %s417_s1 = inlined_call_operand.vmem [shape: bf16[256,128], index: 1, kind: input, shape index: {}]   ;;  %s418_s0 = inlined_call_operand.vmem [shape: bf16[32,256], index: 0, kind: input, shape index: {}]   ;;  %s419_s2 = inlined_call_operand.vmem [shape: f32[1,128], index: 2, kind: input, shape index: {}]   ;;  %s420_s3 = inlined_call_operand.vmem [shape: f32[32,128], index: 3, kind: output, shape index: {}]  }
   0x1   :  { %v300_v0 = vld [vmem:[%s417_s1 + $0x40] sm:$0xff]   ;;  %v302_v2 = vld [vmem:[%s417_s1 + $0x48] sm:$0xff]   ;;  %v304_v4 = vld [vmem:[%s417_s1 + $0x50] sm:$0xff]  }
   0x2   :  { %v301_v1 = vld [vmem:[%s417_s1] sm:$0xff]   ;;  %256 = vmatprep.subr.bf16.mxu0 %v300_v0  ;;  %284 = vmatprep.subr.bf16.mxu1 %v300_v0  ;;  %v303_v3 = vld [vmem:[%s417_s1 + $0x8] sm:$0xff]   ;;  %v305_v5 = vld [vmem:[%s417_s1 + $0x10] sm:$0xff]  }
   0x3   :  { %257 = vmatpush3.bf16.msra.mxu0 %v301_v1  ;;  %292 = vmatpush3.bf16.msra.mxu1 %v301_v1  ;;  %v306_v6 = vld [vmem:[%s417_s1 + $0x58] sm:$0xff]   ;;  %v308_v8 = vld [vmem:[%s417_s1 + $0x60] sm:$0xff]   ;;  %v310_v10 = vld [vmem:[%s417_s1 + $0x68] sm:$0xff]  }
   0x4   :  { %258 = vmatprep.subr.bf16.mxu0 %v302_v2  ;;  %285 = vmatprep.subr.bf16.mxu1 %v302_v2  ;;  %v307_v7 = vld [vmem:[%s417_s1 + $0x18] sm:$0xff]   ;;  %v309_v9 = vld [vmem:[%s417_s1 + $0x20] sm:$0xff]   ;;  %v311_v13 = vld [vmem:[%s417_s1 + $0x28] sm:$0xff]  }
   0x5   :  { %v318_v11 = vld [vmem:[%s418_s0 + $0x4] ss:$8 sps:$4 sm:$0xff]   ;;  %v321_v12 = vld [vmem:[%s418_s0 + $0x14] ss:$8 sps:$4 sm:$0xff]   ;;  %v316_v18 = vld [vmem:[%s418_s0] ss:$8 sps:$4 sm:$0xff]  }
   0x6   :  { %v312_v14 = vld [vmem:[%s417_s1 + $0x70] sm:$0xff]   ;;  %206 = vmatprep.mubr.bf16.mxu0 %v318_v11  ;;  %214 = vmatprep.mubr.bf16.mxu1 %v321_v12  ;;  %v314_v16 = vld [vmem:[%s417_s1 + $0x78] sm:$0xff]   ;;  %v235_v22 = vld [vmem:[%s419_s2] ss:$0 sm:$0xff] }
   0x7   :  { %259 = vmatpush3.bf16.msra.mxu0 %v303_v3  ;;  %293 = vmatpush3.bf16.msra.mxu1 %v303_v3  ;;  %v313_v15 = vld [vmem:[%s417_s1 + $0x30] sm:$0xff]   ;;  %v315_v17 = vld [vmem:[%s417_s1 + $0x38] sm:$0xff]  }
   0x8   :  { %260 = vmatprep.subr.bf16.mxu0 %v304_v4  ;;  %286 = vmatprep.subr.bf16.mxu1 %v304_v4  ;;  %v319_v19 = vld [vmem:[%s418_s0 + $0x10] ss:$8 sps:$4 sm:$0xff]  }
   0xb   :  { %261 = vmatpush3.bf16.msra.mxu0 %v305_v5  ;;  %294 = vmatpush3.bf16.msra.mxu1 %v305_v5 }
   0xc   :  { %262 = vmatprep.subr.bf16.mxu0 %v306_v6  ;;  %287 = vmatprep.subr.bf16.mxu1 %v306_v6 }
   0xf   :  { %263 = vmatpush3.bf16.msra.mxu0 %v307_v7  ;;  %295 = vmatpush3.bf16.msra.mxu1 %v307_v7 }
  0x10   :  { %264 = vmatprep.subr.bf16.mxu0 %v308_v8  ;;  %288 = vmatprep.subr.bf16.mxu1 %v308_v8 }
  0x13   :  { %265 = vmatpush3.bf16.msra.mxu0 %v309_v9  ;;  %296 = vmatpush3.bf16.msra.mxu1 %v309_v9 }
  0x14   :  { %266 = vmatprep.subr.bf16.mxu0 %v310_v10  ;;  %289 = vmatprep.subr.bf16.mxu1 %v310_v10 }
  0x17   :  { %267 = vmatpush3.bf16.msra.mxu0 %v311_v13  ;;  %297 = vmatpush3.bf16.msra.mxu1 %v311_v13 }
  0x18   :  { %268 = vmatprep.subr.bf16.mxu0 %v312_v14  ;;  %290 = vmatprep.subr.bf16.mxu1 %v312_v14 }
  0x1b   :  { %269 = vmatpush3.bf16.msra.mxu0 %v313_v15  ;;  %298 = vmatpush3.bf16.msra.mxu1 %v313_v15 }
  0x1c   :  { %270 = vmatprep.subr.bf16.mxu0 %v314_v16  ;;  %291 = vmatprep.subr.bf16.mxu1 %v314_v16 }
  0x1f   :  { %271 = vmatpush3.bf16.msra.mxu0 %v315_v17  ;;  %299 = vmatpush3.bf16.msra.mxu1 %v315_v17 }
  0x22   :  { %207 = vmatmul.mubr.bf16.vlgmr.msra.gmra.mrb[0].mxu0 %v316_v18  ;;  %215 = vmatmul.mubr.bf16.vlgmr.msra.gmra.mrb[0].mxu1 %v319_v19 }
  0xf5   :  { %v272_v20 = vpop.f32.mrb[0].mxu0  ;;  %v278_v21 = vpop.f32.mrb[0].mxu1 }
  0xf6   :  { %v273_v23 = vpop.f32.mrb[1].mxu0  ;;  %v279_v24 = vpop.f32.mrb[1].mxu1 }
  0xf7   :  { %v274_v25 = vadd.f32 %v273_v23, %v272_v20  ;;  %v280_v26 = vadd.f32 %v279_v24, %v278_v21  ;;  %v275_v27 = vpop.f32.mrb[2].mxu0  ;;  %v281_v28 = vpop.f32.mrb[2].mxu1 }
  0xf8   :  { %v276_v29 = vpop.f32.mrb[3].mxu0  ;;  %v282_v30 = vpop.f32.mrb[3].mxu1 }
  0xf9   :  { %v209_v31 = vadd.f32 %v274_v25, %v235_v22  ;;  %v217_v32 = vadd.f32 %v280_v26, %v235_v22  ;;  %v277_v33 = vadd.f32 %v276_v29, %v275_v27  ;;  %v283_v34 = vadd.f32 %v282_v30, %v281_v28 }
  0xfb   :  { %v223_v35 = vmax.f32 %v209_v31, 0.0  ;;  %v225_v36 = vmax.f32 %v217_v32, 0.0  ;;  %v212_v37 = vadd.f32 %v277_v33, %v235_v22  ;;  %v220_v38 = vadd.f32 %v283_v34, %v235_v22 }
  0xfd   :  { %227 = vst [vmem:[%s420_s3] sm:$0xff] %v223_v35  ;;  %229 = vst [vmem:[%s420_s3 + $0x10] sm:$0xff] %v225_v36  ;;  %v224_v39 = vmax.f32 %v212_v37, 0.0  ;;  %v226_v40 = vmax.f32 %v220_v38, 0.0 }
  0xff   :  { %228 = vst [vmem:[%s420_s3 + $0x8] sm:$0xff] %v224_v39  ;;  %230 = vst [vmem:[%s420_s3 + $0x18] sm:$0xff] %v226_v40 }

// kernel: autoencoder_forward.11
= control target key start
LH: loop header
LB: loop body
LE: loop exit
PB: predicated region body
PF: predicated region fallthrough
CT: control target
= control target key end

     0   :  { %vm321_vm0 = vcmask 261120   ;;  %s2262_s1 = inlined_call_operand.vmem [shape: bf16[288,128], index: 1, kind: input, shape index: {}]   ;;  %s2263_s0 = inlined_call_operand.vmem [shape: bf16[128,288], index: 0, kind: input, shape index: {}]   ;;  %s2264_s3 = inlined_call_operand.vmem [shape: bf16[512,128], index: 3, kind: input, shape index: {}]   ;;  %s2265_s2 = inlined_call_operand.vmem [shape: f32[1,128], index: 2, kind: input, shape index: {}]   ;;  %s2266_s4 = inlined_call_operand.vmem [shape: f32[512,128], index: 4, kind: output, shape index: {}]  }
   0x1   :  { %v1554_v0 = vld [vmem:[%s2262_s1 + $0x40] sm:$0xff]   ;;  %v1556_v2 = vld [vmem:[%s2262_s1 + $0x48] sm:$0xff]   ;;  %v1558_v4 = vld [vmem:[%s2262_s1 + $0x50] sm:$0xff]  }
   0x2   :  { %v1555_v1 = vld [vmem:[%s2262_s1] sm:$0xff]   ;;  %1324 = vmatprep.subr.bf16.mxu0 %v1554_v0  ;;  %v1557_v3 = vld [vmem:[%s2262_s1 + $0x8] sm:$0xff]   ;;  %v1559_v5 = vld [vmem:[%s2262_s1 + $0x10] sm:$0xff]  }
   0x3   :  { %1325 = vmatpush3.bf16.msra.mxu0 %v1555_v1  ;;  %v1560_v6 = vld [vmem:[%s2262_s1 + $0x58] sm:$0xff]   ;;  %v1562_v8 = vld [vmem:[%s2262_s1 + $0x60] sm:$0xff]   ;;  %v1564_v11 = vld [vmem:[%s2262_s1 + $0x68] sm:$0xff]  }
   0x4   :  { %1326 = vmatprep.subr.bf16.mxu0 %v1556_v2  ;;  %v1561_v7 = vld [vmem:[%s2262_s1 + $0x18] sm:$0xff]   ;;  %v1563_v9 = vld [vmem:[%s2262_s1 + $0x20] sm:$0xff]   ;;  %v1565_v12 = vld [vmem:[%s2262_s1 + $0x28] sm:$0xff]  }
   0x5   :  { %v1569_v10 = vld [vmem:[%s2262_s1 + $0x80] sm:$0xff]   ;;  %v1566_v13 = vld [vmem:[%s2262_s1 + $0x70] sm:$0xff]   ;;  %v1574_v15 = vld [vmem:[%s2262_s1 + $0x88] sm:$0xff]  }
   0x6   :  { %1438 = vmatprep.subr.bf16.mxu1 %v1569_v10  ;;  %v1573_v14 = vld [vmem:[%s2263_s0 + $0x4] ss:$12 sps:$4 sm:$0xff]   ;;  %v1575_v16 = vld [vmem:[%s2263_s0 + $0x8] ss:$12 sps:$4 sm:$0xff]   ;;  %v1576_v17 = vld [vmem:[%s2263_s0 + $0x20] ss:$12 sps:$4 sm:$0xff]  }
   0x7   :  { %1327 = vmatpush3.bf16.msra.mxu0 %v1557_v3  ;;  %1439 = vmatpush3.bf16.msra.mxu1 %v1569_v10  ;;  %v1567_v18 = vld [vmem:[%s2262_s1 + $0x30] sm:$0xff]   ;;  %v1568_v19 = vld [vmem:[%s2262_s1 + $0x78] sm:$0xff]   ;;  %v1571_v22 = vld [vmem:[%s2263_s0] ss:$12 sps:$4 sm:$0xff]  }
   0x8   :  { %1328 = vmatprep.subr.bf16.mxu0 %v1558_v4  ;;  %378 = vmatprep.mubr.bf16.mxu0 %v1573_v14  ;;  %v1583_v20 = vld [vmem:[%s2263_s0 + $0x38] ss:$12 sps:$4 sm:$0xff]   ;;  %v1584_v23 = vld [vmem:[%s2263_s0 + $0x50] ss:$12 sps:$4 sm:$0xff]   ;;  %v1591_v24 = vld [vmem:[%s2263_s0 + $0x68] ss:$12 sps:$4 sm:$0xff]  }
   0x9   :  { %1440 = vmatprep.subr.bf16.mxu1 %v1574_v15  ;;  %1442 = vmatprep.mubr.msk.bf16.mxu1 %vm321_vm0, %v1575_v16  ;;  %v1570_v21 = vld [vmem:[%s2262_s1 + $0x38] sm:$0xff]   ;;  %v1592_v26 = vld [vmem:[%s2263_s0 + $0x80] ss:$12 sps:$4 sm:$0xff]   ;;  %v1587_v33 = vld [vmem:[%s2263_s0 + $0x48] ss:$12 sps:$4 sm:$0xff]  }
   0xa   :  { %v1577_v25 = vld [vmem:[%s2263_s0 + $0x1c] ss:$12 sps:$4 sm:$0xff]   ;;  %v1579_v27 = vld [vmem:[%s2263_s0 + $0x18] ss:$12 sps:$4 sm:$0xff]   ;;  %v1580_v29 = vld [vmem:[%s2263_s0 + $0x34] ss:$12 sps:$4 sm:$0xff]  }
   0xb   :  { %1329 = vmatpush3.bf16.msra.mxu0 %v1559_v5  ;;  %1441 = vmatpush3.bf16.msra.mxu1 %v1574_v15  ;;  %v1599_v28 = vld [vmem:[%s2263_s0 + $0x98] ss:$12 sps:$4 sm:$0xff]   ;;  %v1600_v30 = vld [vmem:[%s2263_s0 + $0xb0] ss:$12 sps:$4 sm:$0xff]   ;;  %v1590_v35 = vld [vmem:[%s2263_s0 + $0x60] ss:$12 sps:$4 sm:$0xff]  }
   0xc   :  { %1330 = vmatprep.subr.bf16.mxu0 %v1560_v6  ;;  %v1582_v31 = vld [vmem:[%s2263_s0 + $0x30] ss:$12 sps:$4 sm:$0xff]   ;;  %v1585_v32 = vld [vmem:[%s2263_s0 + $0x4c] ss:$12 sps:$4 sm:$0xff]   ;;  %v1596_v38 = vld [vmem:[%s2263_s0 + $0x94] ss:$12 sps:$4 sm:$0xff]  }
   0xd   :  { %v1588_v34 = vld [vmem:[%s2263_s0 + $0x64] ss:$12 sps:$4 sm:$0xff]   ;;  %v1593_v36 = vld [vmem:[%s2263_s0 + $0x7c] ss:$12 sps:$4 sm:$0xff]   ;;  %v1601_v40 = vld [vmem:[%s2263_s0 + $0xac] ss:$12 sps:$4 sm:$0xff]  }
   0xe   :  { %1443 = vmatmul.mubr.msk.bf16.vlgmr.msra.gmra.mrb[0].mxu1 %vm321_vm0, %v1576_v17  ;;  %v1595_v37 = vld [vmem:[%s2263_s0 + $0x78] ss:$12 sps:$4 sm:$0xff]   ;;  %v1598_v39 = vld [vmem:[%s2263_s0 + $0x90] ss:$12 sps:$4 sm:$0xff]   ;;  %v1603_v41 = vld [vmem:[%s2263_s0 + $0xa8] ss:$12 sps:$4 sm:$0xff]  }
   0xf   :  { %1331 = vmatpush3.bf16.msra.mxu0 %v1561_v7  ;;  %1446 = vmatprep.mubr.msk.bf16.mxu1 %vm321_vm0, %v1583_v20  ;;  %v1604_v42 = vld [vmem:[%s2264_s3 + $0x40] sm:$0xff]  }
  0x10   :  { %1332 = vmatprep.subr.bf16.mxu0 %v1562_v8  ;;  %v1931_v51 = vld [vmem:[%s2265_s2] ss:$0 sm:$0xff] }
  0x11   :  { %v1620_v56 = vld [vmem:[%s2264_s3] sm:$0xff]  }
  0x13   :  { %1333 = vmatpush3.bf16.msra.mxu0 %v1563_v9 }
  0x14   :  { %1334 = vmatprep.subr.bf16.mxu0 %v1564_v11 }
  0x16   :  { %1447 = vmatmul.mubr.msk.bf16.gmra.mrb[4].mxu1 %vm321_vm0, %v1584_v23 }
  0x17   :  { %1335 = vmatpush3.bf16.msra.mxu0 %v1565_v12  ;;  %1450 = vmatprep.mubr.msk.bf16.mxu1 %vm321_vm0, %v1591_v24 }
  0x18   :  { %1336 = vmatprep.subr.bf16.mxu0 %v1566_v13 }
  0x1b   :  { %1337 = vmatpush3.bf16.msra.mxu0 %v1567_v18 }
  0x1c   :  { %1338 = vmatprep.subr.bf16.mxu0 %v1568_v19 }
  0x1e   :  { %1451 = vmatmul.mubr.msk.bf16.gmra.mrb[8].mxu1 %vm321_vm0, %v1592_v26 }
  0x1f   :  { %1339 = vmatpush3.bf16.msra.mxu0 %v1570_v21  ;;  %1454 = vmatprep.mubr.msk.bf16.mxu1 %vm321_vm0, %v1599_v28 }
  0x22   :  { %379 = vmatmul.mubr.bf16.vlgmr.msra.gmra.mrb[0].mxu0 %v1571_v22 }
  0x23   :  { %386 = vmatprep.mubr.bf16.mxu0 %v1577_v25 }
  0x26   :  { %1455 = vmatmul.mubr.msk.bf16.gmra.mrb[12].mxu1 %vm321_vm0, %v1600_v30 }
  0x27   :  { %1490 = vmatprep.mubr.bf16.mxu1 %v1604_v42 }
  0x2a   :  { %387 = vmatmul.mubr.bf16.gmra.mrb[4].mxu0 %v1579_v27 }
  0x2b   :  { %394 = vmatprep.mubr.bf16.mxu0 %v1580_v29 }
  0x32   :  { %395 = vmatmul.mubr.bf16.gmra.mrb[8].mxu0 %v1582_v31 }
  0x33   :  { %402 = vmatprep.mubr.bf16.mxu0 %v1585_v32 }
  0x3a   :  { %403 = vmatmul.mubr.bf16.gmra.mrb[12].mxu0 %v1587_v33 }
  0x3b   :  { %410 = vmatprep.mubr.bf16.mxu0 %v1588_v34 }
  0x42   :  { %411 = vmatmul.mubr.bf16.gmra.mrb[16].mxu0 %v1590_v35 }
  0x43   :  { %418 = vmatprep.mubr.bf16.mxu0 %v1593_v36 }
  0x4a   :  { %419 = vmatmul.mubr.bf16.gmra.mrb[20].mxu0 %v1595_v37 }
  0x4b   :  { %426 = vmatprep.mubr.bf16.mxu0 %v1596_v38 }
  0x52   :  { %427 = vmatmul.mubr.bf16.gmra.mrb[24].mxu0 %v1598_v39 }
  0x53   :  { %434 = vmatprep.mubr.bf16.mxu0 %v1601_v40 }
  0x5a   :  { %435 = vmatmul.mubr.bf16.gmra.mrb[28].mxu0 %v1603_v41 }
  0x5b   :  { %1474 = vmatprep.mubr.bf16.mxu0 %v1620_v56 }
  0xe1   :  { %v1444_v43 = vpop.f32.mrb[0].mxu1 }
  0xe2   :  { %v477_v44 = vpop.f32.mrb[1].mxu1 }
  0xe3   :  { %v1445_v45 = vpop.f32.mrb[2].mxu1 }
  0xe4   :  { %v480_v46 = vpop.f32.mrb[3].mxu1 }
  0xe9   :  { %v1926_v47 = vpop.f32.mrb[4].mxu1 }
  0xea   :  { %v493_v49 = vpop.f32.mrb[5].mxu1 }
  0xeb   :  { %v1933_v52 = vpop.f32.mrb[6].mxu1 }
  0xec   :  { %v496_v55 = vpop.f32.mrb[7].mxu1 }
  0xf1   :  { %v1940_v62 = vpop.f32.mrb[8].mxu1 }
  0xf2   :  { %v1942_v1 = vpop.f32.mrb[9].mxu1 }
  0xf3   :  { %v1944_v3 = vpop.f32.mrb[10].mxu1 }
  0xf4   :  { %v1946_v8 = vpop.f32.mrb[11].mxu1 }
  0xf5   :  { %v1340_v48 = vpop.f32.mrb[0].mxu0 }
  0xf6   :  { %v1341_v50 = vpop.f32.mrb[1].mxu0 }
  0xf7   :  { %v1342_v53 = vadd.f32 %v1341_v50, %v1340_v48  ;;  %v1343_v54 = vpop.f32.mrb[2].mxu0 }
  0xf8   :  { %v1344_v57 = vpop.f32.mrb[3].mxu0 }
  0xf9   :  { %v1345_v58 = vadd.f32 %v1344_v57, %v1343_v54  ;;  %v381_v59 = vadd.f32 %v1342_v53, %v1931_v51  ;;  %v1950_v15 = vpop.f32.mrb[12].mxu1 }
  0xfa   :  { %v1952_v18 = vpop.f32.mrb[13].mxu1 }
  0xfb   :  { %v478_v60 = vadd.f32 %v477_v44, %v381_v59  ;;  %v384_v61 = vadd.f32 %v1345_v58, %v1931_v51  ;;  %v1954_v20 = vpop.f32.mrb[14].mxu1 }
  0xfc   :  { %v1956_v25 = vpop.f32.mrb[15].mxu1 }
  0xfd   :  { %v481_v63 = vadd.f32 %v480_v46, %v384_v61  ;;  %v1346_v0 = vpop.f32.mrb[4].mxu0  ;;  %v540_v4 = vmax.f32 %v478_v60, 0.0 }
  0xfe   :  { %v1347_v2 = vpop.f32.mrb[5].mxu0 }
  0xff   :  { %v541_v5 = vmax.f32 %v481_v63, 0.0  ;;  %v1348_v6 = vadd.f32 %v1347_v2, %v1346_v0  ;;  %v1349_v7 = vpop.f32.mrb[6].mxu0 }
 0x100   :  { %v1350_v9 = vpop.f32.mrb[7].mxu0 }
 0x101   :  { %v620_v10 = vpack.c.bf16 %v541_v5, %v540_v4  ;;  %v389_v11 = vadd.f32 %v1348_v6, %v1931_v51  ;;  %v1351_v12 = vadd.f32 %v1350_v9, %v1349_v7 }
 0x103   :  { %v486_v13 = vadd.f32 %v1444_v43, %v389_v11  ;;  %v392_v14 = vadd.f32 %v1351_v12, %v1931_v51  ;;  %1458 = vmatprep.subr.bf16.mxu0 %v620_v10  ;;  %1538 = vmatprep.subr.bf16.mxu1 %v620_v10 }
 0x104   :  { %1459 = vmatpush3.bf16.msra.mxu0 %v620_v10  ;;  %1546 = vmatpush3.bf16.msra.mxu1 %v620_v10 }
 0x105   :  { %v489_v16 = vadd.f32 %v1445_v45, %v392_v14  ;;  %v1352_v17 = vpop.f32.mrb[8].mxu0  ;;  %v542_v21 = vmax.f32 %v486_v13, 0.0 }
 0x106   :  { %v1353_v19 = vpop.f32.mrb[9].mxu0 }
 0x107   :  { %v543_v22 = vmax.f32 %v489_v16, 0.0  ;;  %v1354_v23 = vadd.f32 %v1353_v19, %v1352_v17  ;;  %v1355_v24 = vpop.f32.mrb[10].mxu0 }
 0x108   :  { %v1356_v26 = vpop.f32.mrb[11].mxu0 }
 0x109   :  { %v621_v27 = vpack.c.bf16 %v543_v22, %v542_v21  ;;  %v1357_v28 = vadd.f32 %v1356_v26, %v1355_v24  ;;  %v397_v29 = vadd.f32 %v1354_v23, %v1931_v51 }
 0x10b   :  { %v494_v30 = vadd.f32 %v493_v49, %v397_v29  ;;  %1460 = vmatprep.subr.bf16.mxu0 %v621_v27  ;;  %1539 = vmatprep.subr.bf16.mxu1 %v621_v27  ;;  %v400_v31 = vadd.f32 %v1357_v28, %v1931_v51 }
 0x10c   :  { %1461 = vmatpush3.bf16.msra.mxu0 %v621_v27  ;;  %1547 = vmatpush3.bf16.msra.mxu1 %v621_v27 }
 0x10d   :  { %v497_v32 = vadd.f32 %v496_v55, %v400_v31  ;;  %v1358_v33 = vpop.f32.mrb[12].mxu0  ;;  %v544_v35 = vmax.f32 %v494_v30, 0.0 }
 0x10e   :  { %v1359_v34 = vpop.f32.mrb[13].mxu0 }
 0x10f   :  { %v545_v36 = vmax.f32 %v497_v32, 0.0  ;;  %v1360_v37 = vadd.f32 %v1359_v34, %v1358_v33  ;;  %v1361_v38 = vpop.f32.mrb[14].mxu0 }
 0x110   :  { %v1362_v39 = vpop.f32.mrb[15].mxu0 }
 0x111   :  { %v622_v40 = vpack.c.bf16 %v545_v36, %v544_v35  ;;  %v405_v41 = vadd.f32 %v1360_v37, %v1931_v51  ;;  %v1363_v42 = vadd.f32 %v1362_v39, %v1361_v38 }
 0x113   :  { %v502_v43 = vadd.f32 %v1926_v47, %v405_v41  ;;  %v408_v44 = vadd.f32 %v1363_v42, %v1931_v51  ;;  %1462 = vmatprep.subr.bf16.mxu0 %v622_v40  ;;  %1540 = vmatprep.subr.bf16.mxu1 %v622_v40  ;;  %v1607_v41 = vld [vmem:[%s2264_s3 + $0x58] sm:$0xff]  }
 0x114   :  { %1463 = vmatpush3.bf16.msra.mxu0 %v622_v40  ;;  %1548 = vmatpush3.bf16.msra.mxu1 %v622_v40  ;;  %v1605_v40 = vld [vmem:[%s2264_s3 + $0x48] sm:$0xff]   ;;  %v1625_v42 = vld [vmem:[%s2264_s3 + $0x18] sm:$0xff]  }
 0x115   :  { %v505_v45 = vadd.f32 %v1933_v52, %v408_v44  ;;  %v1364_v46 = vpop.f32.mrb[16].mxu0  ;;  %v546_v49 = vmax.f32 %v502_v43, 0.0  ;;  %v1608_v43 = vld [vmem:[%s2264_s3 + $0x60] sm:$0xff]  }
 0x116   :  { %v1365_v48 = vpop.f32.mrb[17].mxu0  ;;  %v1628_v44 = vld [vmem:[%s2264_s3 + $0x20] sm:$0xff]  }
 0x117   :  { %v547_v50 = vmax.f32 %v505_v45, 0.0  ;;  %v1366_v53 = vadd.f32 %v1365_v48, %v1364_v46  ;;  %v1367_v54 = vpop.f32.mrb[18].mxu0  ;;  %v1609_v45 = vld [vmem:[%s2264_s3 + $0x68] sm:$0xff]   ;;  %v1610_v48 = vld [vmem:[%s2264_s3 + $0x70] sm:$0xff]  }
 0x118   :  { %v1368_v55 = vpop.f32.mrb[19].mxu0  ;;  %v1629_v46 = vld [vmem:[%s2264_s3 + $0x28] sm:$0xff]  }
 0x119   :  { %v623_v56 = vpack.c.bf16 %v547_v50, %v546_v49  ;;  %v1369_v57 = vadd.f32 %v1368_v55, %v1367_v54  ;;  %v413_v58 = vadd.f32 %v1366_v53, %v1931_v51  ;;  %v1632_v49 = vld [vmem:[%s2264_s3 + $0x30] sm:$0xff]   ;;  %v1611_v50 = vld [vmem:[%s2264_s3 + $0x78] sm:$0xff]   ;;  %v1612_v54 = vld [vmem:[%s2264_s3 + $0x80] sm:$0xff]  }
 0x11a   :  { %v1633_v53 = vld [vmem:[%s2264_s3 + $0x38] sm:$0xff]   ;;  %v1613_v55 = vld [vmem:[%s2264_s3 + $0x88] sm:$0xff]  }
 0x11b   :  { %v510_v47 = vadd.f32 %v1942_v1, %v413_v58  ;;  %1464 = vmatprep.subr.bf16.mxu0 %v623_v56  ;;  %1541 = vmatprep.subr.bf16.mxu1 %v623_v56  ;;  %v416_v59 = vadd.f32 %v1369_v57, %v1931_v51  ;;  %v1615_v57 = vld [vmem:[%s2264_s3 + $0x98] sm:$0xff]   ;;  %v1616_v58 = vld [vmem:[%s2264_s3 + $0xa0] sm:$0xff]  }
 0x11c   :  { %1465 = vmatpush3.bf16.msra.mxu0 %v623_v56  ;;  %1549 = vmatpush3.bf16.msra.mxu1 %v623_v56  ;;  %v1614_v56 = vld [vmem:[%s2264_s3 + $0x90] sm:$0xff]  }
 0x11d   :  { %v513_v52 = vadd.f32 %v1946_v8, %v416_v59  ;;  %v1370_v60 = vpop.f32.mrb[20].mxu0  ;;  %v548_v63 = vmax.f32 %v510_v47, 0.0  ;;  %v1617_v47 = vld [vmem:[%s2264_s3 + $0xa8] sm:$0xff]   ;;  %v1618_v59 = vld [vmem:[%s2264_s3 + $0xb0] sm:$0xff]  }
 0x11e   :  { %v1371_v61 = vpop.f32.mrb[21].mxu0 }
 0x11f   :  { %v549_v0 = vmax.f32 %v513_v52, 0.0  ;;  %v1372_v2 = vadd.f32 %v1371_v61, %v1370_v60  ;;  %v1373_v4 = vpop.f32.mrb[22].mxu0  ;;  %v1619_v52 = vld [vmem:[%s2264_s3 + $0xb8] sm:$0xff]   ;;  %v1622_v60 = vld [vmem:[%s2264_s3 + $0xc0] sm:$0xff]   ;;  %v1623_v61 = vld [vmem:[%s2264_s3 + $0xc8] sm:$0xff]  }
 0x120   :  { %v1374_v5 = vpop.f32.mrb[23].mxu0 }
 0x121   :  { %v624_v6 = vpack.c.bf16 %v549_v0, %v548_v63  ;;  %v421_v7 = vadd.f32 %v1372_v2, %v1931_v51  ;;  %v1375_v9 = vadd.f32 %v1374_v5, %v1373_v4  ;;  %v1626_v63 = vld [vmem:[%s2264_s3 + $0xd0] sm:$0xff]   ;;  %v1627_v0 = vld [vmem:[%s2264_s3 + $0xd8] sm:$0xff]   ;;  %v1630_v2 = vld [vmem:[%s2264_s3 + $0xe0] sm:$0xff]  }
 0x122   :  { %v1631_v4 = vld [vmem:[%s2264_s3 + $0xe8] sm:$0xff]   ;;  %v1634_v5 = vld [vmem:[%s2264_s3 + $0xf0] sm:$0xff]  }
 0x123   :  { %v518_v1 = vadd.f32 %v1940_v62, %v421_v7  ;;  %v424_v10 = vadd.f32 %v1375_v9, %v1931_v51  ;;  %1466 = vmatprep.subr.bf16.mxu0 %v624_v6  ;;  %1542 = vmatprep.subr.bf16.mxu1 %v624_v6 }
 0x124   :  { %1467 = vmatpush3.bf16.msra.mxu0 %v624_v6  ;;  %1550 = vmatpush3.bf16.msra.mxu1 %v624_v6  ;;  %v1635_v6 = vld [vmem:[%s2264_s3 + $0xf8] sm:$0xff]  }
 0x125   :  { %v521_v8 = vadd.f32 %v1944_v3, %v424_v10  ;;  %v1376_v11 = vpop.f32.mrb[24].mxu0  ;;  %v550_v13 = vmax.f32 %v518_v1, 0.0 }
 0x126   :  { %v1377_v12 = vpop.f32.mrb[25].mxu0 }
 0x127   :  { %v551_v14 = vmax.f32 %v521_v8, 0.0  ;;  %v1378_v16 = vadd.f32 %v1377_v12, %v1376_v11  ;;  %v1379_v17 = vpop.f32.mrb[26].mxu0 }
 0x128   :  { %v1380_v19 = vpop.f32.mrb[27].mxu0 }
 0x129   :  { %v625_v21 = vpack.c.bf16 %v551_v14, %v550_v13  ;;  %v1381_v22 = vadd.f32 %v1380_v19, %v1379_v17  ;;  %v429_v23 = vadd.f32 %v1378_v16, %v1931_v51 }
 0x12b   :  { %v526_v62 = vadd.f32 %v1952_v18, %v429_v23  ;;  %1468 = vmatprep.subr.bf16.mxu0 %v625_v21  ;;  %1543 = vmatprep.subr.bf16.mxu1 %v625_v21  ;;  %v432_v24 = vadd.f32 %v1381_v22, %v1931_v51 }
 0x12c   :  { %1469 = vmatpush3.bf16.msra.mxu0 %v625_v21  ;;  %1551 = vmatpush3.bf16.msra.mxu1 %v625_v21 }
 0x12d   :  { %v529_v3 = vadd.f32 %v1956_v25, %v432_v24  ;;  %v1382_v26 = vpop.f32.mrb[28].mxu0  ;;  %v552_v28 = vmax.f32 %v526_v62, 0.0 }
 0x12e   :  { %v1383_v27 = vpop.f32.mrb[29].mxu0 }
 0x12f   :  { %v553_v29 = vmax.f32 %v529_v3, 0.0  ;;  %v1384_v30 = vadd.f32 %v1383_v27, %v1382_v26  ;;  %v1385_v31 = vpop.f32.mrb[30].mxu0 }
 0x130   :  { %v1386_v32 = vpop.f32.mrb[31].mxu0 }
 0x131   :  { %v626_v33 = vpack.c.bf16 %v553_v29, %v552_v28  ;;  %v437_v34 = vadd.f32 %v1384_v30, %v1931_v51  ;;  %v1387_v35 = vadd.f32 %v1386_v32, %v1385_v31 }
 0x133   :  { %v534_v18 = vadd.f32 %v1950_v15, %v437_v34  ;;  %v440_v36 = vadd.f32 %v1387_v35, %v1931_v51  ;;  %1470 = vmatprep.subr.bf16.mxu0 %v626_v33  ;;  %1544 = vmatprep.subr.bf16.mxu1 %v626_v33  ;;  %v1621_v15 = vld [vmem:[%s2264_s3 + $0x8] sm:$0xff]   ;;  %v1606_v51 = vld [vmem:[%s2264_s3 + $0x50] sm:$0xff]  }
 0x134   :  { %1471 = vmatpush3.bf16.msra.mxu0 %v626_v33  ;;  %1552 = vmatpush3.bf16.msra.mxu1 %v626_v33 }
 0x135   :  { %v537_v25 = vadd.f32 %v1954_v20, %v440_v36  ;;  %v554_v37 = vmax.f32 %v534_v18, 0.0  ;;  %v1624_v20 = vld [vmem:[%s2264_s3 + $0x10] sm:$0xff]  }
 0x137   :  { %v555_v38 = vmax.f32 %v537_v25, 0.0 }
 0x139   :  { %v627_v39 = vpack.c.bf16 %v555_v38, %v554_v37 }
 0x13b   :  { %1472 = vmatprep.subr.bf16.mxu0 %v627_v39  ;;  %1545 = vmatprep.subr.bf16.mxu1 %v627_v39 }
 0x13c   :  { %1473 = vmatpush3.bf16.msra.mxu0 %v627_v39  ;;  %1553 = vmatpush3.bf16.msra.mxu1 %v627_v39 }
 0x13f   :  { %1491 = vmatmul.mubr.bf16.vlgmr.msra.gmra.mrb[16].mxu1 %v1605_v40  ;;  %1475 = vmatmul.mubr.bf16.vlgmr.msra.gmra.mrb[32].mxu0 %v1621_v15 }
 0x140   :  { %1494 = vmatprep.mubr.bf16.mxu1 %v1606_v51  ;;  %1478 = vmatprep.mubr.bf16.mxu0 %v1624_v20 }
 0x147   :  { %1495 = vmatmul.mubr.bf16.gmra.mrb[20].mxu1 %v1607_v41  ;;  %1479 = vmatmul.mubr.bf16.gmra.mrb[36].mxu0 %v1625_v42 }
 0x148   :  { %1498 = vmatprep.mubr.bf16.mxu1 %v1608_v43  ;;  %1482 = vmatprep.mubr.bf16.mxu0 %v1628_v44 }
 0x14f   :  { %1499 = vmatmul.mubr.bf16.gmra.mrb[24].mxu1 %v1609_v45  ;;  %1483 = vmatmul.mubr.bf16.gmra.mrb[40].mxu0 %v1629_v46 }
 0x150   :  { %1502 = vmatprep.mubr.bf16.mxu1 %v1610_v48  ;;  %1486 = vmatprep.mubr.bf16.mxu0 %v1632_v49 }
 0x157   :  { %1503 = vmatmul.mubr.bf16.gmra.mrb[28].mxu1 %v1611_v50  ;;  %1487 = vmatmul.mubr.bf16.gmra.mrb[44].mxu0 %v1633_v53 }
 0x158   :  { %1506 = vmatprep.mubr.bf16.mxu1 %v1612_v54 }
 0x15f   :  { %1507 = vmatmul.mubr.bf16.gmra.mrb[32].mxu1 %v1613_v55 }
 0x160   :  { %1510 = vmatprep.mubr.bf16.mxu1 %v1614_v56 }
 0x167   :  { %1511 = vmatmul.mubr.bf16.gmra.mrb[36].mxu1 %v1615_v57 }
 0x168   :  { %1514 = vmatprep.mubr.bf16.mxu1 %v1616_v58 }
 0x16f   :  { %1515 = vmatmul.mubr.bf16.gmra.mrb[40].mxu1 %v1617_v47 }
 0x170   :  { %1518 = vmatprep.mubr.bf16.mxu1 %v1618_v59 }
 0x177   :  { %1519 = vmatmul.mubr.bf16.gmra.mrb[44].mxu1 %v1619_v52 }
 0x178   :  { %1522 = vmatprep.mubr.bf16.mxu1 %v1622_v60 }
 0x17f   :  { %1523 = vmatmul.mubr.bf16.gmra.mrb[48].mxu1 %v1623_v61 }
 0x180   :  { %1526 = vmatprep.mubr.bf16.mxu1 %v1626_v63 }
 0x187   :  { %1527 = vmatmul.mubr.bf16.gmra.mrb[52].mxu1 %v1627_v0 }
 0x188   :  { %1530 = vmatprep.mubr.bf16.mxu1 %v1630_v2 }
 0x18f   :  { %1531 = vmatmul.mubr.bf16.gmra.mrb[56].mxu1 %v1631_v4 }
 0x190   :  { %1534 = vmatprep.mubr.bf16.mxu1 %v1634_v5 }
 0x197   :  { %1535 = vmatmul.mubr.bf16.gmra.mrb[60].mxu1 %v1635_v6 }
 0x212   :  { %v1492_v7 = vpop.f32.mrb[16].mxu1  ;;  %v1476_v9 = vpop.f32.mrb[32].mxu0 }
 0x213   :  { %1636 = vtanh.f32 %v1492_v7  ;;  %v918_v1 = vpop.f32.mrb[17].mxu1  ;;  %v854_v10 = vpop.f32.mrb[33].mxu0 }
 0x214   :  { %1638 = vtanh.f32 %v918_v1  ;;  %v1493_v8 = vpop.f32.mrb[18].mxu1  ;;  %v1477_v11 = vpop.f32.mrb[34].mxu0 }
 0x215   :  { %1640 = vtanh.f32 %v1493_v8  ;;  %v921_v12 = vpop.f32.mrb[19].mxu1  ;;  %v857_v13 = vpop.f32.mrb[35].mxu0 }
 0x216   :  { %1642 = vtanh.f32 %v921_v12 }
 0x217   :  { %1644 = vtanh.f32 %v1476_v9 }
 0x218   :  { %1646 = vtanh.f32 %v854_v10 }
 0x219   :  { %1648 = vtanh.f32 %v1477_v11 }
 0x21a   :  { %v1496_v14 = vpop.f32.mrb[20].mxu1  ;;  %1650 = vtanh.f32 %v857_v13  ;;  %v1480_v16 = vpop.f32.mrb[36].mxu0 }
 0x21b   :  { %1652 = vtanh.f32 %v1496_v14  ;;  %v934_v17 = vpop.f32.mrb[21].mxu1  ;;  %v870_v19 = vpop.f32.mrb[37].mxu0 }
 0x21c   :  { %1654 = vtanh.f32 %v934_v17  ;;  %v1497_v21 = vpop.f32.mrb[22].mxu1  ;;  %v1481_v22 = vpop.f32.mrb[38].mxu0 }
 0x21d   :  { %v1637_v23 = vpop.eup %1636  ;;  %1656 = vtanh.f32 %v1497_v21  ;;  %v937_v62 = vpop.f32.mrb[23].mxu1 }
 0x21e   :  { %v873_v24 = vpop.f32.mrb[39].mxu0  ;;  %v1639_v3 = vpop.eup %1638  ;;  %1191 = vst [vmem:[%s2266_s4 + $0x90] sm:$0xff] %v1637_v23  ;;  %1658 = vtanh.f32 %v937_v62 }
 0x21f   :  { %v1641_v26 = vpop.eup %1640  ;;  %1189 = vst [vmem:[%s2266_s4 + $0x80] sm:$0xff] %v1639_v3  ;;  %1660 = vtanh.f32 %v1480_v16 }
 0x220   :  { %v1643_v27 = vpop.eup %1642  ;;  %1192 = vst [vmem:[%s2266_s4 + $0x98] sm:$0xff] %v1641_v26  ;;  %1662 = vtanh.f32 %v870_v19 }
 0x221   :  { %v1645_v28 = vpop.eup %1644  ;;  %1190 = vst [vmem:[%s2266_s4 + $0x88] sm:$0xff] %v1643_v27  ;;  %1664 = vtanh.f32 %v1481_v22 }
 0x222   :  { %v1647_v29 = vpop.eup %1646  ;;  %v1500_v30 = vpop.f32.mrb[24].mxu1  ;;  %1175 = vst [vmem:[%s2266_s4 + $0x10] sm:$0xff] %v1645_v28  ;;  %1666 = vtanh.f32 %v873_v24 }
 0x223   :  { %v1484_v31 = vpop.f32.mrb[40].mxu0  ;;  %v1649_v32 = vpop.eup %1648  ;;  %1668 = vtanh.f32 %v1500_v30  ;;  %1173 = vst [vmem:[%s2266_s4] sm:$0xff] %v1647_v29 }
 0x224   :  { %v950_v33 = vpop.f32.mrb[25].mxu1  ;;  %v886_v34 = vpop.f32.mrb[41].mxu0  ;;  %1176 = vst [vmem:[%s2266_s4 + $0x18] sm:$0xff] %v1649_v32 }
 0x225   :  { %v1651_v35 = vpop.eup %1650  ;;  %1670 = vtanh.f32 %v950_v33  ;;  %v1501_v18 = vpop.f32.mrb[26].mxu1 }
 0x226   :  { %v1485_v36 = vpop.f32.mrb[42].mxu0  ;;  %v1653_v25 = vpop.eup %1652  ;;  %1672 = vtanh.f32 %v1501_v18  ;;  %1174 = vst [vmem:[%s2266_s4 + $0x8] sm:$0xff] %v1651_v35 }
 0x227   :  { %v953_v37 = vpop.f32.mrb[27].mxu1  ;;  %v889_v38 = vpop.f32.mrb[43].mxu0  ;;  %1195 = vst [vmem:[%s2266_s4 + $0xb0] sm:$0xff] %v1653_v25 }
 0x228   :  { %v1655_v39 = vpop.eup %1654  ;;  %1674 = vtanh.f32 %v953_v37 }
 0x229   :  { %v1657_v40 = vpop.eup %1656  ;;  %1193 = vst [vmem:[%s2266_s4 + $0xa0] sm:$0xff] %v1655_v39  ;;  %1676 = vtanh.f32 %v1484_v31 }
 0x22a   :  { %v1659_v15 = vpop.eup %1658  ;;  %1196 = vst [vmem:[%s2266_s4 + $0xb8] sm:$0xff] %v1657_v40  ;;  %1678 = vtanh.f32 %v886_v34  ;;  %v1504_v41 = vpop.f32.mrb[28].mxu1 }
 0x22b   :  { %v1661_v51 = vpop.eup %1660  ;;  %1194 = vst [vmem:[%s2266_s4 + $0xa8] sm:$0xff] %v1659_v15  ;;  %1680 = vtanh.f32 %v1485_v36  ;;  %v1488_v42 = vpop.f32.mrb[44].mxu0 }
 0x22c   :  { %v1663_v20 = vpop.eup %1662  ;;  %1179 = vst [vmem:[%s2266_s4 + $0x30] sm:$0xff] %v1661_v51  ;;  %1682 = vtanh.f32 %v889_v38  ;;  %v966_v44 = vpop.f32.mrb[29].mxu1 }
 0x22d   :  { %v1665_v43 = vpop.eup %1664  ;;  %1684 = vtanh.f32 %v1504_v41  ;;  %1177 = vst [vmem:[%s2266_s4 + $0x20] sm:$0xff] %v1663_v20  ;;  %v902_v45 = vpop.f32.mrb[45].mxu0 }
 0x22e   :  { %v1667_v46 = vpop.eup %1666  ;;  %1686 = vtanh.f32 %v966_v44  ;;  %v1505_v48 = vpop.f32.mrb[30].mxu1  ;;  %1180 = vst [vmem:[%s2266_s4 + $0x38] sm:$0xff] %v1665_v43 }
 0x22f   :  { %v1489_v49 = vpop.f32.mrb[46].mxu0  ;;  %v1669_v50 = vpop.eup %1668  ;;  %1688 = vtanh.f32 %v1505_v48  ;;  %1178 = vst [vmem:[%s2266_s4 + $0x28] sm:$0xff] %v1667_v46 }
 0x230   :  { %v969_v53 = vpop.f32.mrb[31].mxu1  ;;  %v905_v54 = vpop.f32.mrb[47].mxu0  ;;  %1199 = vst [vmem:[%s2266_s4 + $0xd0] sm:$0xff] %v1669_v50 }
 0x231   :  { %v1671_v55 = vpop.eup %1670  ;;  %1690 = vtanh.f32 %v969_v53 }
 0x232   :  { %v1673_v56 = vpop.eup %1672  ;;  %1197 = vst [vmem:[%s2266_s4 + $0xc0] sm:$0xff] %v1671_v55  ;;  %1692 = vtanh.f32 %v1488_v42  ;;  %v1508_v59 = vpop.f32.mrb[32].mxu1 }
 0x233   :  { %v1675_v57 = vpop.eup %1674  ;;  %1200 = vst [vmem:[%s2266_s4 + $0xd8] sm:$0xff] %v1673_v56  ;;  %1694 = vtanh.f32 %v902_v45  ;;  %v982_v60 = vpop.f32.mrb[33].mxu1 }
 0x234   :  { %v1677_v58 = vpop.eup %1676  ;;  %1198 = vst [vmem:[%s2266_s4 + $0xc8] sm:$0xff] %v1675_v57  ;;  %1696 = vtanh.f32 %v1489_v49  ;;  %v1509_v63 = vpop.f32.mrb[34].mxu1 }
 0x235   :  { %v1679_v47 = vpop.eup %1678  ;;  %1183 = vst [vmem:[%s2266_s4 + $0x50] sm:$0xff] %v1677_v58  ;;  %1698 = vtanh.f32 %v905_v54  ;;  %v985_v2 = vpop.f32.mrb[35].mxu1 }
 0x236   :  { %v1681_v52 = vpop.eup %1680  ;;  %1700 = vtanh.f32 %v1508_v59  ;;  %1181 = vst [vmem:[%s2266_s4 + $0x40] sm:$0xff] %v1679_v47 }
 0x237   :  { %v1683_v61 = vpop.eup %1682  ;;  %1702 = vtanh.f32 %v982_v60  ;;  %1184 = vst [vmem:[%s2266_s4 + $0x58] sm:$0xff] %v1681_v52 }
 0x238   :  { %v1685_v0 = vpop.eup %1684  ;;  %1704 = vtanh.f32 %v1509_v63  ;;  %1182 = vst [vmem:[%s2266_s4 + $0x48] sm:$0xff] %v1683_v61 }
 0x239   :  { %v1687_v4 = vpop.eup %1686  ;;  %1203 = vst [vmem:[%s2266_s4 + $0xf0] sm:$0xff] %v1685_v0  ;;  %1706 = vtanh.f32 %v985_v2 }
 0x23a   :  { %v1689_v5 = vpop.eup %1688  ;;  %1201 = vst [vmem:[%s2266_s4 + $0xe0] sm:$0xff] %v1687_v4  ;;  %v1512_v1 = vpop.f32.mrb[36].mxu1 }
 0x23b   :  { %v1691_v6 = vpop.eup %1690  ;;  %1204 = vst [vmem:[%s2266_s4 + $0xf8] sm:$0xff] %v1689_v5  ;;  %1708 = vtanh.f32 %v1512_v1  ;;  %v998_v8 = vpop.f32.mrb[37].mxu1 }
 0x23c   :  { %v1693_v7 = vpop.eup %1692  ;;  %1202 = vst [vmem:[%s2266_s4 + $0xe8] sm:$0xff] %v1691_v6  ;;  %1710 = vtanh.f32 %v998_v8  ;;  %v1513_v12 = vpop.f32.mrb[38].mxu1 }
 0x23d   :  { %v1695_v9 = vpop.eup %1694  ;;  %1187 = vst [vmem:[%s2266_s4 + $0x70] sm:$0xff] %v1693_v7  ;;  %1712 = vtanh.f32 %v1513_v12  ;;  %v1001_v14 = vpop.f32.mrb[39].mxu1 }
 0x23e   :  { %v1697_v10 = vpop.eup %1696  ;;  %1185 = vst [vmem:[%s2266_s4 + $0x60] sm:$0xff] %v1695_v9  ;;  %1714 = vtanh.f32 %v1001_v14 }
 0x23f   :  { %v1699_v11 = vpop.eup %1698  ;;  %1188 = vst [vmem:[%s2266_s4 + $0x78] sm:$0xff] %v1697_v10 }
 0x240   :  { %v1701_v13 = vpop.eup %1700  ;;  %1186 = vst [vmem:[%s2266_s4 + $0x68] sm:$0xff] %v1699_v11 }
 0x241   :  { %v1703_v16 = vpop.eup %1702  ;;  %1207 = vst [vmem:[%s2266_s4 + $0x110] sm:$0xff] %v1701_v13 }
 0x242   :  { %v1705_v17 = vpop.eup %1704  ;;  %1205 = vst [vmem:[%s2266_s4 + $0x100] sm:$0xff] %v1703_v16  ;;  %v1516_v21 = vpop.f32.mrb[40].mxu1 }
 0x243   :  { %v1707_v19 = vpop.eup %1706  ;;  %1208 = vst [vmem:[%s2266_s4 + $0x118] sm:$0xff] %v1705_v17  ;;  %1716 = vtanh.f32 %v1516_v21  ;;  %v1014_v22 = vpop.f32.mrb[41].mxu1 }
 0x244   :  { %1206 = vst [vmem:[%s2266_s4 + $0x108] sm:$0xff] %v1707_v19  ;;  %1718 = vtanh.f32 %v1014_v22  ;;  %v1517_v23 = vpop.f32.mrb[42].mxu1 }
 0x245   :  { %v1709_v62 = vpop.eup %1708  ;;  %1720 = vtanh.f32 %v1517_v23  ;;  %v1017_v24 = vpop.f32.mrb[43].mxu1 }
 0x246   :  { %v1711_v3 = vpop.eup %1710  ;;  %1211 = vst [vmem:[%s2266_s4 + $0x130] sm:$0xff] %v1709_v62  ;;  %1722 = vtanh.f32 %v1017_v24 }
 0x247   :  { %v1713_v26 = vpop.eup %1712  ;;  %1209 = vst [vmem:[%s2266_s4 + $0x120] sm:$0xff] %v1711_v3 }
 0x248   :  { %v1715_v27 = vpop.eup %1714  ;;  %1212 = vst [vmem:[%s2266_s4 + $0x138] sm:$0xff] %v1713_v26 }
 0x249   :  { %1210 = vst [vmem:[%s2266_s4 + $0x128] sm:$0xff] %v1715_v27 }
 0x24a   :  { %v1520_v28 = vpop.f32.mrb[44].mxu1 }
 0x24b   :  { %1724 = vtanh.f32 %v1520_v28  ;;  %v1030_v29 = vpop.f32.mrb[45].mxu1 }
 0x24c   :  { %1726 = vtanh.f32 %v1030_v29  ;;  %v1521_v30 = vpop.f32.mrb[46].mxu1 }
 0x24d   :  { %v1717_v31 = vpop.eup %1716  ;;  %1728 = vtanh.f32 %v1521_v30  ;;  %v1033_v32 = vpop.f32.mrb[47].mxu1 }
 0x24e   :  { %v1719_v33 = vpop.eup %1718  ;;  %1215 = vst [vmem:[%s2266_s4 + $0x150] sm:$0xff] %v1717_v31  ;;  %1730 = vtanh.f32 %v1033_v32 }
 0x24f   :  { %v1721_v34 = vpop.eup %1720  ;;  %1213 = vst [vmem:[%s2266_s4 + $0x140] sm:$0xff] %v1719_v33 }
 0x250   :  { %v1723_v35 = vpop.eup %1722  ;;  %1216 = vst [vmem:[%s2266_s4 + $0x158] sm:$0xff] %v1721_v34 }
 0x251   :  { %1214 = vst [vmem:[%s2266_s4 + $0x148] sm:$0xff] %v1723_v35 }
 0x252   :  { %v1524_v18 = vpop.f32.mrb[48].mxu1 }
 0x253   :  { %1732 = vtanh.f32 %v1524_v18  ;;  %v1046_v36 = vpop.f32.mrb[49].mxu1 }
 0x254   :  { %1734 = vtanh.f32 %v1046_v36  ;;  %v1525_v25 = vpop.f32.mrb[50].mxu1 }
 0x255   :  { %v1725_v37 = vpop.eup %1724  ;;  %1736 = vtanh.f32 %v1525_v25  ;;  %v1049_v38 = vpop.f32.mrb[51].mxu1 }
 0x256   :  { %v1727_v39 = vpop.eup %1726  ;;  %1219 = vst [vmem:[%s2266_s4 + $0x170] sm:$0xff] %v1725_v37  ;;  %1738 = vtanh.f32 %v1049_v38 }
 0x257   :  { %v1729_v40 = vpop.eup %1728  ;;  %1217 = vst [vmem:[%s2266_s4 + $0x160] sm:$0xff] %v1727_v39 }
 0x258   :  { %v1731_v15 = vpop.eup %1730  ;;  %1220 = vst [vmem:[%s2266_s4 + $0x178] sm:$0xff] %v1729_v40 }
 0x259   :  { %1218 = vst [vmem:[%s2266_s4 + $0x168] sm:$0xff] %v1731_v15 }
 0x25a   :  { %v1528_v51 = vpop.f32.mrb[52].mxu1 }
 0x25b   :  { %1740 = vtanh.f32 %v1528_v51  ;;  %v1062_v20 = vpop.f32.mrb[53].mxu1 }
 0x25c   :  { %1742 = vtanh.f32 %v1062_v20  ;;  %v1529_v41 = vpop.f32.mrb[54].mxu1 }
 0x25d   :  { %v1733_v42 = vpop.eup %1732  ;;  %1744 = vtanh.f32 %v1529_v41  ;;  %v1065_v43 = vpop.f32.mrb[55].mxu1 }
 0x25e   :  { %v1735_v44 = vpop.eup %1734  ;;  %1223 = vst [vmem:[%s2266_s4 + $0x190] sm:$0xff] %v1733_v42  ;;  %1746 = vtanh.f32 %v1065_v43 }
 0x25f   :  { %v1737_v45 = vpop.eup %1736  ;;  %1221 = vst [vmem:[%s2266_s4 + $0x180] sm:$0xff] %v1735_v44 }
 0x260   :  { %v1739_v46 = vpop.eup %1738  ;;  %1224 = vst [vmem:[%s2266_s4 + $0x198] sm:$0xff] %v1737_v45 }
 0x261   :  { %1222 = vst [vmem:[%s2266_s4 + $0x188] sm:$0xff] %v1739_v46 }
 0x262   :  { %v1532_v48 = vpop.f32.mrb[56].mxu1 }
 0x263   :  { %1748 = vtanh.f32 %v1532_v48  ;;  %v1078_v49 = vpop.f32.mrb[57].mxu1 }
 0x264   :  { %1750 = vtanh.f32 %v1078_v49  ;;  %v1533_v50 = vpop.f32.mrb[58].mxu1 }
 0x265   :  { %v1741_v53 = vpop.eup %1740  ;;  %1752 = vtanh.f32 %v1533_v50  ;;  %v1081_v54 = vpop.f32.mrb[59].mxu1 }
 0x266   :  { %v1743_v55 = vpop.eup %1742  ;;  %1227 = vst [vmem:[%s2266_s4 + $0x1b0] sm:$0xff] %v1741_v53  ;;  %1754 = vtanh.f32 %v1081_v54 }
 0x267   :  { %v1745_v56 = vpop.eup %1744  ;;  %1225 = vst [vmem:[%s2266_s4 + $0x1a0] sm:$0xff] %v1743_v55 }
 0x268   :  { %v1747_v57 = vpop.eup %1746  ;;  %1228 = vst [vmem:[%s2266_s4 + $0x1b8] sm:$0xff] %v1745_v56 }
 0x269   :  { %1226 = vst [vmem:[%s2266_s4 + $0x1a8] sm:$0xff] %v1747_v57 }
 0x26a   :  { %v1536_v58 = vpop.f32.mrb[60].mxu1 }
 0x26b   :  { %1756 = vtanh.f32 %v1536_v58  ;;  %v1094_v47 = vpop.f32.mrb[61].mxu1 }
 0x26c   :  { %1758 = vtanh.f32 %v1094_v47  ;;  %v1537_v59 = vpop.f32.mrb[62].mxu1 }
 0x26d   :  { %v1749_v52 = vpop.eup %1748  ;;  %1760 = vtanh.f32 %v1537_v59  ;;  %v1097_v60 = vpop.f32.mrb[63].mxu1 }
 0x26e   :  { %v1751_v61 = vpop.eup %1750  ;;  %1231 = vst [vmem:[%s2266_s4 + $0x1d0] sm:$0xff] %v1749_v52  ;;  %1762 = vtanh.f32 %v1097_v60 }
 0x26f   :  { %v1753_v63 = vpop.eup %1752  ;;  %1229 = vst [vmem:[%s2266_s4 + $0x1c0] sm:$0xff] %v1751_v61 }
 0x270   :  { %v1755_v0 = vpop.eup %1754  ;;  %1232 = vst [vmem:[%s2266_s4 + $0x1d8] sm:$0xff] %v1753_v63 }
 0x271   :  { %1230 = vst [vmem:[%s2266_s4 + $0x1c8] sm:$0xff] %v1755_v0 }
 0x275   :  { %v1757_v2 = vpop.eup %1756 }
 0x276   :  { %v1759_v4 = vpop.eup %1758  ;;  %1235 = vst [vmem:[%s2266_s4 + $0x1f0] sm:$0xff] %v1757_v2 }
 0x277   :  { %v1761_v5 = vpop.eup %1760  ;;  %1233 = vst [vmem:[%s2266_s4 + $0x1e0] sm:$0xff] %v1759_v4 }
 0x278   :  { %v1763_v6 = vpop.eup %1762  ;;  %1236 = vst [vmem:[%s2266_s4 + $0x1f8] sm:$0xff] %v1761_v5 }
 0x279   :  { %1234 = vst [vmem:[%s2266_s4 + $0x1e8] sm:$0xff] %v1763_v6 }

</bundles_post_ra>
